<compile_context>
chip_gen: v5e
topology: v5e:2x2
jax: 0.10.0
libtpu: 0.0.40
codegen_flags: <defaults>
</compile_context>

<pallas_src>
import math
import numpy as np
import jax
import jax.numpy as jnp
from jax import lax
from jax.experimental import pallas as pl
from jax.experimental.pallas import tpu as pltpu

D_MODEL = 32
N_HEAD = 1
N_ATOM = 3            # the module's broadcasts require n_atoms == 3
NUM_LAYERS = 2
N_GRAPHS = 8          # independent bs=1 graphs batched into the kernel
D_PAD = 40            # D_MODEL + 1 bias row, padded to a multiple of 8
EPS_LN = 1e-5
NEG_INF = -1e9


# ---------------------------------------------------------------------------
# Kernel helpers (traced inside the Pallas kernel)
# ---------------------------------------------------------------------------
def _dot(a, b, dims):
    return lax.dot_general(a, b, (dims, ((), ())),
                           preferred_element_type=jnp.float32)


def _layernorm(y):
    # Affine (gamma/beta) is folded into the following linear on the host.
    mu = jnp.mean(y, axis=-1, keepdims=True)
    yc = y - mu
    var = jnp.mean(yc * yc, axis=-1, keepdims=True)
    return yc * lax.rsqrt(var + EPS_LN)


def _softmax(z):
    # Denominator >= 1, so the approximate EUP reciprocal is safe here.
    m = jnp.max(z, axis=-1, keepdims=True)
    e = jnp.exp(z - m)
    return e * pl.reciprocal(jnp.sum(e, axis=-1, keepdims=True), approx=True)


# ---------------------------------------------------------------------------
# The Pallas kernel: full Graphormer forward for one block of graphs.
# ---------------------------------------------------------------------------
def graphormer_kernel(x_ref, r_ref, rt_ref, encb_ref, gmask_ref,
                      enc_ref, g_ref, out_ref):
    D, N, DP = D_MODEL, N_ATOM, D_PAD
    GBN = x_ref.shape[1]          # graphs_per_block * N_ATOM (static)
    GB = GBN // N

    x = x_ref[0]                  # (GBN, D)   stacked node features
    r = r_ref[0]                  # (GBN, 3)   stacked coordinates
    rt = rt_ref[0]                # (3, GBN)   coordinates, transposed (host)
    enc_bias = encb_ref[0]        # (GBN, GBN) block-diag mask, -1e9 off-block
    gmask = gmask_ref[0]          # (GBN, GBN) block-diag mask, 0 off-block

    ones_pad = jnp.ones((GBN, DP - D), jnp.float32)   # bias "ones" columns

    # ----------------- Encoder stack (mask is the additive bias) ------------
    # enc_ref[l]: rows 0..D-1 fused (LN-folded) weights [Wq|Wk|Wv|W1|W2],
    #             row D = fused biases, rows D+1..DP-1 = 0.  1/sqrt(head_dim)
    #             is folded into the q columns.
    for l in range(NUM_LAYERS):
        res = x
        y = jnp.concatenate([_layernorm(x), ones_pad], axis=1)       # (GBN, DP)
        qkv = _dot(y, enc_ref[l, :, 0:3 * D], ((1,), (0,)))          # (GBN, 3D)
        q = qkv[:, 0:D]
        k = qkv[:, D:2 * D]
        v = qkv[:, 2 * D:3 * D]
        logits = _dot(q, k, ((1,), (1,))) + enc_bias                 # (GBN, GBN)
        attw = _softmax(logits)          # cross-graph weights are exactly 0
        x = _dot(attw, v, ((1,), (0,))) + res                        # dropout==id
        y2 = jnp.concatenate([_layernorm(x), ones_pad], axis=1)
        h = jnp.maximum(_dot(y2, enc_ref[l, :, 3 * D:4 * D], ((1,), (0,))), 0.0)
        h = jnp.concatenate([h, ones_pad], axis=1)
        x = _dot(h, enc_ref[l, :, 4 * D:5 * D], ((1,), (0,)))
        # NB: the source module has no residual after the MLP.

    # ----------------- Graph_3D ---------------------------------------------
    # Pairwise distances from direct coordinate differences (no Gram-form
    # cancellation; diagonal is exactly 0, matching torch.cdist).
    d0 = r[:, 0:1] - rt[0:1, :]
    d1 = r[:, 1:2] - rt[1:2, :]
    d2 = r[:, 2:3] - rt[2:3, :]
    r0 = jnp.sqrt(d0 * d0 + d1 * d1 + d2 * d2)                       # (GBN, GBN)
    bias_g = jnp.exp(-r0)

    # Graph attention (n_head == 1).  g_ref: rows 0..D-1 = [Wq*scale | Wk],
    # row D = [bq*scale | bk], rows D+1..DP-1 = 0,
    # row DP = [Wo@Wv (D) | Wo.bv | zeros | gbo | zeros].
    x_aug = jnp.concatenate([x, ones_pad], axis=1)                   # (GBN, DP)
    qk = _dot(x_aug, g_ref[0:DP, :], ((1,), (0,)))                   # (GBN, 2D)
    q = qk[:, 0:D]
    k = qk[:, D:2 * D]
    logits = _dot(q, k, ((1,), (1,))) + bias_g
    logits = jnp.where(gmask == 0.0, NEG_INF, logits)
    attw = _softmax(logits)                                          # (GBN, GBN)

    # o_proj folded through the v projection, computed in row form.
    vw = _dot(g_ref[DP:DP + 1, 0:DP], x_aug, ((1,), (1,)))           # (1, GBN)
    gbo = g_ref[DP:DP + 1, DP:DP + 1]                                # (1, 1)

    # Module semantics (n_atoms == 3 broadcast), per graph block:
    #   out[q, i] = sum_c attw[q,c] * vw[c] * (r[q,c]-r[i,c]) / (r0[q,c]+1e-6)
    #               + gbo
    gmat = attw * vw / (r0 + 1e-6)          # exact divide (review), keep f32
    # Fold the key axis onto the 3 coordinates: off-block attw is exactly 0,
    # so summing the GB column blocks recovers the per-graph (GBN, 3) factor.
    gsum = gmat[:, 0:N]
    for gb in range(1, GB):
        gsum = gsum + gmat[:, gb * N:(gb + 1) * N]                   # (GBN, 3)
    rowterm = jnp.sum(gsum * r, axis=-1, keepdims=True)              # (GBN, 1)
    cross = (gsum[:, 0:1] * rt[0:1, :]
             + gsum[:, 1:2] * rt[1:2, :]
             + gsum[:, 2:3] * rt[2:3, :])                            # (GBN, GBN)
    out_ref[0] = (rowterm - cross) + gbo


# ---------------------------------------------------------------------------
# Host-side parameter packing (fold LN affine + attention scale + o_proj,
# move biases into the padded weight rows so they ride the matmuls).
# ---------------------------------------------------------------------------
def _pack_params(p):
    D, L, DP = D_MODEL, NUM_LAYERS, D_PAD
    scale = 1.0 / math.sqrt(D // N_HEAD)
    zpad = jnp.zeros((DP - D - 1, 5 * D), jnp.float32)
    layers = []
    for l in range(L):
        ln1w = p["ln1w"][l].reshape(D, 1)
        ln1b = p["ln1b"][l].reshape(1, D)
        ln2w = p["ln2w"][l].reshape(D, 1)
        ln2b = p["ln2b"][l].reshape(1, D)
        wq, wk, wv = p["wq"][l], p["wk"][l], p["wv"][l]
        w1, w2 = p["w1"][l], p["w2"][l]
        bq, bk, bv = p["bq"][l], p["bk"][l], p["bv"][l]
        b1, b2 = p["b1"][l], p["b2"][l]
        W = jnp.concatenate(
            [ln1w * wq.T * scale, ln1w * wk.T, ln1w * wv.T,
             ln2w * w1.T, w2.T], axis=1)                              # (D, 5D)
        B = jnp.concatenate(
            [(ln1b @ wq.T + bq) * scale, ln1b @ wk.T + bk, ln1b @ wv.T + bv,
             ln2b @ w1.T + b1, b2], axis=1)                           # (1, 5D)
        layers.append(jnp.concatenate([W, B, zpad], axis=0))          # (DP, 5D)
    enc_slab = jnp.stack(layers, axis=0).astype(jnp.float32)          # (L,DP,5D)

    gvo = p["gwo"] @ p["gwv"]                                         # (1, D)
    bvo = p["gwo"] @ p["gbv"].T                                       # (1, 1)
    gqk_w = jnp.concatenate([p["gwq"].T * scale, p["gwk"].T], axis=1)  # (D, 2D)
    gqk_b = jnp.concatenate([p["gbq"] * scale, p["gbk"]], axis=1)      # (1, 2D)
    zrows = jnp.zeros((DP - D - 1, 2 * D), jnp.float32)
    last = jnp.concatenate(
        [gvo, bvo, jnp.zeros((1, DP - D - 1), jnp.float32),
         p["gbo"], jnp.zeros((1, 2 * D - DP - 1), jnp.float32)], axis=1)
    g_slab = jnp.concatenate([gqk_w, gqk_b, zrows, last],
                             axis=0).astype(jnp.float32)               # (DP+1,2D)
    return enc_slab, g_slab


# ---------------------------------------------------------------------------
# Wrapper
# ---------------------------------------------------------------------------
def graphormer_forward(x, r, mask, p, num_blocks=None):
    """x: (G, 1, N, D), r: (G, 1, N, 3), mask: (G, 1, 1, N, N).
    G independent bs=1 graphs; returns (G, 1, N, 3, 1) (module output/graph)."""
    G, N, D = x.shape[0], N_ATOM, D_MODEL
    assert x.shape[-2] == 3 and N_ATOM == 3, (
        "the module's broadcast semantics only hold for n_atoms == 3")
    if num_blocks is None:
        # 2 blocks shard across v7x's two TensorCores via the parallel grid;
        # the extra sequential step on v5e/v6e costs ~0.35us (noise here).
        num_blocks = 2 if (G % 2 == 0 and G >= 2) else 1
    assert G % num_blocks == 0
    NB = num_blocks
    GB = G // NB
    GBN = GB * N

    xb = x.reshape(G * N, D).astype(jnp.float32).reshape(NB, GBN, D)
    rb = r.reshape(G * N, 3).astype(jnp.float32).reshape(NB, GBN, 3)
    rt = jnp.transpose(rb, (0, 2, 1))                                 # (NB,3,GBN)

    # Block-diagonal masks (layout plumbing on the host).
    m = mask.reshape(G, N, N).astype(jnp.float32).reshape(NB, GB, N, N)
    eye = jnp.eye(GB, dtype=jnp.float32)
    gmask = jnp.einsum('bgij,gh->bgihj', m, eye).reshape(NB, GBN, GBN)
    same = jnp.einsum('gh,ij->gihj', eye,
                      jnp.ones((N, N), jnp.float32)).reshape(GBN, GBN)
    enc_bias = jnp.where(same[None] > 0.5, gmask, NEG_INF)

    enc_slab, g_slab = _pack_params(p)

    out = pl.pallas_call(
        graphormer_kernel,
        out_shape=jax.ShapeDtypeStruct((NB, GBN, GBN), jnp.float32),
        grid=(NB,),
        in_specs=[
            pl.BlockSpec((1, GBN, D), lambda b: (b, 0, 0)),        # x
            pl.BlockSpec((1, GBN, 3), lambda b: (b, 0, 0)),        # r
            pl.BlockSpec((1, 3, GBN), lambda b: (b, 0, 0)),        # r^T
            pl.BlockSpec((1, GBN, GBN), lambda b: (b, 0, 0)),      # encoder bias
            pl.BlockSpec((1, GBN, GBN), lambda b: (b, 0, 0)),      # graph mask
            pl.BlockSpec(enc_slab.shape, lambda b: (0, 0, 0)),     # weights (inv)
            pl.BlockSpec(g_slab.shape, lambda b: (0, 0)),          # weights (inv)
        ],
        out_specs=pl.BlockSpec((1, GBN, GBN), lambda b: (b, 0, 0)),
        compiler_params=pltpu.CompilerParams(
            dimension_semantics=("parallel",)),
    )(xb, rb, rt, enc_bias, gmask, enc_slab, g_slab)

    # Extract the per-graph 3x3 diagonal blocks (layout plumbing only).
    arr = out.reshape(NB, GB, N, GB, N)
    per_graph = jnp.einsum('bgihj,gh->bgij', arr, eye)                # (NB,GB,N,N)
    return per_graph.reshape(G, 1, N, N, 1)


# ---------------------------------------------------------------------------
# Deterministic parameter init (PyTorch-like uniform(-1/sqrt(fan_in), ...))
# ---------------------------------------------------------------------------
def init_params(key):
    L, D = NUM_LAYERS, D_MODEL
    s = 1.0 / math.sqrt(D)
    keys = iter(jax.random.split(key, 40))

    def u(shape, scale=s):
        return jax.random.uniform(next(keys), shape, jnp.float32, -scale, scale)

    p = {}
    p["ln1w"] = 1.0 + 0.1 * u((L, 1, D), 1.0)
    p["ln1b"] = 0.1 * u((L, 1, D), 1.0)
    p["ln2w"] = 1.0 + 0.1 * u((L, 1, D), 1.0)
    p["ln2b"] = 0.1 * u((L, 1, D), 1.0)
    for name in ("wq", "wk", "wv", "w1", "w2"):
        p[name] = u((L, D, D))
    for name in ("bq", "bk", "bv", "b1", "b2"):
        p[name] = u((L, 1, D))
    for name in ("gwq", "gwk", "gwv"):
        p[name] = u((D, D))
    for name in ("gbq", "gbk", "gbv"):
        p[name] = u((1, D))
    p["gwo"] = u((1, D))
    p["gbo"] = u((1, 1))
    return p


# ---------------------------------------------------------------------------
# Pure-JAX reference mirroring the PyTorch forward (incl. odd broadcasts)
# ---------------------------------------------------------------------------
def ref_forward(x, r, mask, p):
    nh, hd = N_HEAD, D_MODEL // N_HEAD

    def linear(y, W, b):
        return jnp.matmul(y, W.T) + b.reshape(-1)

    def ln(y, w, b):
        mu = jnp.mean(y, -1, keepdims=True)
        var = jnp.mean((y - mu) ** 2, -1, keepdims=True)
        return (y - mu) / jnp.sqrt(var + EPS_LN) * w.reshape(-1) + b.reshape(-1)

    def softmax(z):
        z = z - z.max(-1, keepdims=True)
        e = jnp.exp(z)
        return e / e.sum(-1, keepdims=True)

    bs = x.shape[0]
    for l in range(NUM_LAYERS):
        res = x
        y = ln(x, p["ln1w"][l], p["ln1b"][l])
        q = linear(y, p["wq"][l], p["bq"][l]).reshape(bs, -1, nh, hd).transpose(0, 2, 1, 3)
        k = linear(y, p["wk"][l], p["bk"][l]).reshape(bs, -1, nh, hd).transpose(0, 2, 1, 3)
        v = linear(y, p["wv"][l], p["bv"][l]).reshape(bs, -1, nh, hd).transpose(0, 2, 1, 3)
        logits = jnp.matmul(q, jnp.swapaxes(k, -2, -1)) / math.sqrt(hd) + mask
        attw = softmax(logits)
        x = jnp.matmul(attw, v) + res
        y2 = ln(x, p["ln2w"][l], p["ln2b"][l])
        h = jax.nn.relu(linear(y2, p["w1"][l], p["b1"][l]))
        x = linear(h, p["w2"][l], p["b2"][l])

    r0 = jnp.sqrt(jnp.sum((r[:, :, None, :] - r[:, None, :, :]) ** 2, -1))
    bias = jnp.exp(-r0)
    delta_pos = (r[:, None, :, :] - r[:, :, None, :]) / (r0 + 1e-6)

    bsz = x.shape[0]
    q = linear(x, p["gwq"], p["gbq"]).reshape(bsz, -1, nh, hd).transpose(0, 2, 1, 3)
    k = linear(x, p["gwk"], p["gbk"]).reshape(bsz, -1, nh, hd).transpose(0, 2, 1, 3)
    v = linear(x, p["gwv"], p["gbv"]).reshape(bsz, -1, nh, hd).transpose(0, 2, 1, 3)
    logits = jnp.matmul(q, jnp.swapaxes(k, -2, -1)) / math.sqrt(hd) + bias
    logits = jnp.where(mask == 0, -1e9, logits)
    attw = softmax(logits)
    atten_3D = delta_pos[:, None] * jnp.transpose(attw[..., None], (0, 1, 4, 2, 3))
    v5 = v[:, :, None]
    o = jnp.matmul(atten_3D, v5)
    o = jnp.transpose(o, (0, 3, 2, 1, 4)).reshape(bsz, -1, 3, D_MODEL)
    force = linear(o, p["gwo"], p["gbo"])
    return force


# ---------------------------------------------------------------------------
if __name__ == "__main__":
    key = jax.random.PRNGKey(0)
    kx, kr, km, kp = jax.random.split(key, 4)

    G = N_GRAPHS
    x = jax.random.normal(kx, (G, 1, N_ATOM, D_MODEL), jnp.float32)
    r = jax.random.normal(kr, (G, 1, N_ATOM, 3), jnp.float32)
    # 0/1 mask per graph: additive bias in the encoders, masked_fill mask in
    # the graph attention.  Keep the diagonal unmasked.
    bern = jax.random.bernoulli(km, 0.7, (G, 1, 1, N_ATOM, N_ATOM)).astype(jnp.float32)
    mask = jnp.maximum(bern, jnp.eye(N_ATOM, dtype=jnp.float32))

    params = init_params(kp)

    out = graphormer_forward(x, r, mask, params)
    out = jax.block_until_ready(out)

    ref = jnp.stack([ref_forward(x[g], r[g], mask[g], params) for g in range(G)])
    ref = jax.block_until_ready(ref)

    out_np = np.asarray(out)
    ref_np = np.asarray(ref)
    # The module divides by (r0 + 1e-6) on a zero diagonal, so outputs contain
    # ~1e6-amplified terms; scale atol with the output magnitude accordingly.
    atol = 1e-4 * float(np.max(np.abs(ref_np))) + 1e-3
    np.testing.assert_allclose(out_np, ref_np, rtol=5e-2, atol=atol)
    assert out.shape == (G, 1, N_ATOM, 3, 1)

    print("KERNEL_OK")
</pallas_src>

<mosaic_0001>
module attributes {stable_mosaic.version = 11 : i64} {
  func.func @graphormer_kernel(%arg0: i32, %arg1: memref<1x12x32xf32, #tpu.memory_space<vmem>>, %arg2: memref<1x12x3xf32, #tpu.memory_space<vmem>>, %arg3: memref<1x3x12xf32, #tpu.memory_space<vmem>>, %arg4: memref<1x12x12xf32, #tpu.memory_space<vmem>>, %arg5: memref<1x12x12xf32, #tpu.memory_space<vmem>>, %arg6: memref<2x40x160xf32, #tpu.memory_space<vmem>>, %arg7: memref<41x64xf32, #tpu.memory_space<vmem>>, %arg8: memref<1x12x12xf32, #tpu.memory_space<vmem>>) attributes {dimension_semantics = [#tpu.dimension_semantics<parallel>], iteration_bounds = array<i64: 2>, scalar_prefetch = 0 : i64, scratch_operands = 0 : i64, tpu.core_type = #tpu.core_type<tc>, window_params = [{transform_indices = @transform_0, window_bounds = array<i64: 1, 12, 32>}, {transform_indices = @transform_1, window_bounds = array<i64: 1, 12, 3>}, {transform_indices = @transform_2, window_bounds = array<i64: 1, 3, 12>}, {transform_indices = @transform_3, window_bounds = array<i64: 1, 12, 12>}, {transform_indices = @transform_4, window_bounds = array<i64: 1, 12, 12>}, {pipeline_mode = #tpu.pipeline_mode<synchronous>, transform_indices = @transform_5, window_bounds = array<i64: 2, 40, 160>}, {pipeline_mode = #tpu.pipeline_mode<synchronous>, transform_indices = @transform_6, window_bounds = array<i64: 41, 64>}, {transform_indices = @transform_7, window_bounds = array<i64: 1, 12, 12>}]} {
    %c0 = arith.constant 0 : index
    %c0_0 = arith.constant 0 : index
    %c0_1 = arith.constant 0 : index
    %0 = vector.load %arg1[%c0, %c0_0, %c0_1] : memref<1x12x32xf32, #tpu.memory_space<vmem>>, vector<1x12x32xf32>
    %1 = vector.shape_cast %0 : vector<1x12x32xf32> to vector<12x32xf32>
    %c0_2 = arith.constant 0 : index
    %c0_3 = arith.constant 0 : index
    %c0_4 = arith.constant 0 : index
    %2 = vector.load %arg2[%c0_2, %c0_3, %c0_4] : memref<1x12x3xf32, #tpu.memory_space<vmem>>, vector<1x12x3xf32>
    %3 = vector.shape_cast %2 : vector<1x12x3xf32> to vector<12x3xf32>
    %c0_5 = arith.constant 0 : index
    %c0_6 = arith.constant 0 : index
    %c0_7 = arith.constant 0 : index
    %4 = vector.load %arg3[%c0_5, %c0_6, %c0_7] : memref<1x3x12xf32, #tpu.memory_space<vmem>>, vector<1x3x12xf32>
    %5 = vector.shape_cast %4 : vector<1x3x12xf32> to vector<3x12xf32>
    %c0_8 = arith.constant 0 : index
    %c0_9 = arith.constant 0 : index
    %c0_10 = arith.constant 0 : index
    %6 = vector.load %arg4[%c0_8, %c0_9, %c0_10] : memref<1x12x12xf32, #tpu.memory_space<vmem>>, vector<1x12x12xf32>
    %7 = vector.shape_cast %6 : vector<1x12x12xf32> to vector<12x12xf32>
    %c0_11 = arith.constant 0 : index
    %c0_12 = arith.constant 0 : index
    %c0_13 = arith.constant 0 : index
    %8 = vector.load %arg5[%c0_11, %c0_12, %c0_13] : memref<1x12x12xf32, #tpu.memory_space<vmem>>, vector<1x12x12xf32>
    %9 = vector.shape_cast %8 : vector<1x12x12xf32> to vector<12x12xf32>
    %cst = arith.constant 1.000000e+00 : f32
    %10 = vector.broadcast %cst : f32 to vector<12x8xf32>
    %cst_14 = arith.constant dense<0.000000e+00> : vector<12xf32>
    %11 = vector.multi_reduction <add>, %1, %cst_14 [1] : vector<12x32xf32> to vector<12xf32>
    %12 = vector.shape_cast %11 : vector<12xf32> to vector<12x1xf32>
    %cst_15 = arith.constant 3.200000e+01 : f32
    %13 = vector.broadcast %cst_15 : f32 to vector<12x1xf32>
    %14 = arith.divf %12, %13 : vector<12x1xf32>
    %15 = vector.broadcast %14 : vector<12x1xf32> to vector<12x32xf32>
    %16 = arith.subf %1, %15 : vector<12x32xf32>
    %17 = arith.mulf %16, %16 : vector<12x32xf32>
    %cst_16 = arith.constant dense<0.000000e+00> : vector<12xf32>
    %18 = vector.multi_reduction <add>, %17, %cst_16 [1] : vector<12x32xf32> to vector<12xf32>
    %19 = vector.shape_cast %18 : vector<12xf32> to vector<12x1xf32>
    %cst_17 = arith.constant 3.200000e+01 : f32
    %20 = vector.broadcast %cst_17 : f32 to vector<12x1xf32>
    %21 = arith.divf %19, %20 : vector<12x1xf32>
    %cst_18 = arith.constant 9.99999974E-6 : f32
    %22 = vector.broadcast %cst_18 : f32 to vector<12x1xf32>
    %23 = arith.addf %21, %22 : vector<12x1xf32>
    %24 = math.rsqrt %23 : vector<12x1xf32>
    %25 = vector.broadcast %24 : vector<12x1xf32> to vector<12x32xf32>
    %26 = arith.mulf %16, %25 : vector<12x32xf32>
    %27 = tpu.concatenate %26, %10 in 1 : vector<12x32xf32>, vector<12x8xf32> -> vector<12x40xf32>
    %c0_19 = arith.constant 0 : index
    %c0_20 = arith.constant 0 : index
    %c0_21 = arith.constant 0 : index
    %28 = vector.load %arg6[%c0_19, %c0_20, %c0_21] : memref<2x40x160xf32, #tpu.memory_space<vmem>>, vector<1x40x96xf32>
    %29 = vector.shape_cast %28 : vector<1x40x96xf32> to vector<40x96xf32>
    %cst_22 = arith.constant dense<0.000000e+00> : vector<12x96xf32>
    %30 = tpu.matmul %27, %29, %cst_22 {dimension_numbers = #tpu.dot_dimension_numbers<[1], [0], [0], [1], [0, 0, 1, 1], [], []>} : vector<12x40xf32>, vector<40x96xf32>, vector<12x96xf32> -> vector<12x96xf32>
    %31 = vector.extract_strided_slice %30 {offsets = [0, 0], sizes = [12, 32], strides = [1, 1]} : vector<12x96xf32> to vector<12x32xf32>
    %32 = vector.extract_strided_slice %30 {offsets = [0, 32], sizes = [12, 32], strides = [1, 1]} : vector<12x96xf32> to vector<12x32xf32>
    %33 = vector.extract_strided_slice %30 {offsets = [0, 64], sizes = [12, 32], strides = [1, 1]} : vector<12x96xf32> to vector<12x32xf32>
    %cst_23 = arith.constant dense<0.000000e+00> : vector<12x12xf32>
    %34 = tpu.matmul %31, %32, %cst_23 {dimension_numbers = #tpu.dot_dimension_numbers<[1], [1], [0], [0], [0, 0, 1, 0], [], []>} : vector<12x32xf32>, vector<12x32xf32>, vector<12x12xf32> -> vector<12x12xf32>
    %35 = arith.addf %34, %7 : vector<12x12xf32>
    %cst_24 = arith.constant dense<0xFF800000> : vector<12xf32>
    %36 = vector.multi_reduction <maximumf>, %35, %cst_24 [1] : vector<12x12xf32> to vector<12xf32>
    %37 = vector.shape_cast %36 : vector<12xf32> to vector<12x1xf32>
    %38 = vector.broadcast %37 : vector<12x1xf32> to vector<12x12xf32>
    %39 = arith.subf %35, %38 : vector<12x12xf32>
    %40 = math.exp %39 : vector<12x12xf32>
    %cst_25 = arith.constant dense<0.000000e+00> : vector<12xf32>
    %41 = vector.multi_reduction <add>, %40, %cst_25 [1] : vector<12x12xf32> to vector<12xf32>
    %42 = vector.shape_cast %41 : vector<12xf32> to vector<12x1xf32>
    %43 = tpu.reciprocal %42 {approx = true} : vector<12x1xf32> -> vector<12x1xf32>
    %44 = vector.broadcast %43 : vector<12x1xf32> to vector<12x12xf32>
    %45 = arith.mulf %40, %44 : vector<12x12xf32>
    %cst_26 = arith.constant dense<0.000000e+00> : vector<12x32xf32>
    %46 = tpu.matmul %45, %33, %cst_26 {dimension_numbers = #tpu.dot_dimension_numbers<[1], [0], [0], [1], [0, 0, 1, 1], [], []>} : vector<12x12xf32>, vector<12x32xf32>, vector<12x32xf32> -> vector<12x32xf32>
    %47 = arith.addf %46, %1 : vector<12x32xf32>
    %cst_27 = arith.constant dense<0.000000e+00> : vector<12xf32>
    %48 = vector.multi_reduction <add>, %47, %cst_27 [1] : vector<12x32xf32> to vector<12xf32>
    %49 = vector.shape_cast %48 : vector<12xf32> to vector<12x1xf32>
    %cst_28 = arith.constant 3.200000e+01 : f32
    %50 = vector.broadcast %cst_28 : f32 to vector<12x1xf32>
    %51 = arith.divf %49, %50 : vector<12x1xf32>
    %52 = vector.broadcast %51 : vector<12x1xf32> to vector<12x32xf32>
    %53 = arith.subf %47, %52 : vector<12x32xf32>
    %54 = arith.mulf %53, %53 : vector<12x32xf32>
    %cst_29 = arith.constant dense<0.000000e+00> : vector<12xf32>
    %55 = vector.multi_reduction <add>, %54, %cst_29 [1] : vector<12x32xf32> to vector<12xf32>
    %56 = vector.shape_cast %55 : vector<12xf32> to vector<12x1xf32>
    %cst_30 = arith.constant 3.200000e+01 : f32
    %57 = vector.broadcast %cst_30 : f32 to vector<12x1xf32>
    %58 = arith.divf %56, %57 : vector<12x1xf32>
    %cst_31 = arith.constant 9.99999974E-6 : f32
    %59 = vector.broadcast %cst_31 : f32 to vector<12x1xf32>
    %60 = arith.addf %58, %59 : vector<12x1xf32>
    %61 = math.rsqrt %60 : vector<12x1xf32>
    %62 = vector.broadcast %61 : vector<12x1xf32> to vector<12x32xf32>
    %63 = arith.mulf %53, %62 : vector<12x32xf32>
    %64 = tpu.concatenate %63, %10 in 1 : vector<12x32xf32>, vector<12x8xf32> -> vector<12x40xf32>
    %c0_32 = arith.constant 0 : index
    %c0_33 = arith.constant 0 : index
    %c96 = arith.constant 96 : index
    %65 = vector.load %arg6[%c0_32, %c0_33, %c96] : memref<2x40x160xf32, #tpu.memory_space<vmem>>, vector<1x40x32xf32>
    %66 = vector.shape_cast %65 : vector<1x40x32xf32> to vector<40x32xf32>
    %cst_34 = arith.constant dense<0.000000e+00> : vector<12x32xf32>
    %67 = tpu.matmul %64, %66, %cst_34 {dimension_numbers = #tpu.dot_dimension_numbers<[1], [0], [0], [1], [0, 0, 1, 1], [], []>} : vector<12x40xf32>, vector<40x32xf32>, vector<12x32xf32> -> vector<12x32xf32>
    %cst_35 = arith.constant 0.000000e+00 : f32
    %68 = vector.broadcast %cst_35 : f32 to vector<12x32xf32>
    %69 = arith.maximumf %67, %68 : vector<12x32xf32>
    %70 = tpu.concatenate %69, %10 in 1 : vector<12x32xf32>, vector<12x8xf32> -> vector<12x40xf32>
    %c0_36 = arith.constant 0 : index
    %c0_37 = arith.constant 0 : index
    %c128 = arith.constant 128 : index
    %71 = vector.load %arg6[%c0_36, %c0_37, %c128] : memref<2x40x160xf32, #tpu.memory_space<vmem>>, vector<1x40x32xf32>
    %72 = vector.shape_cast %71 : vector<1x40x32xf32> to vector<40x32xf32>
    %cst_38 = arith.constant dense<0.000000e+00> : vector<12x32xf32>
    %73 = tpu.matmul %70, %72, %cst_38 {dimension_numbers = #tpu.dot_dimension_numbers<[1], [0], [0], [1], [0, 0, 1, 1], [], []>} : vector<12x40xf32>, vector<40x32xf32>, vector<12x32xf32> -> vector<12x32xf32>
    %cst_39 = arith.constant dense<0.000000e+00> : vector<12xf32>
    %74 = vector.multi_reduction <add>, %73, %cst_39 [1] : vector<12x32xf32> to vector<12xf32>
    %75 = vector.shape_cast %74 : vector<12xf32> to vector<12x1xf32>
    %cst_40 = arith.constant 3.200000e+01 : f32
    %76 = vector.broadcast %cst_40 : f32 to vector<12x1xf32>
    %77 = arith.divf %75, %76 : vector<12x1xf32>
    %78 = vector.broadcast %77 : vector<12x1xf32> to vector<12x32xf32>
    %79 = arith.subf %73, %78 : vector<12x32xf32>
    %80 = arith.mulf %79, %79 : vector<12x32xf32>
    %cst_41 = arith.constant dense<0.000000e+00> : vector<12xf32>
    %81 = vector.multi_reduction <add>, %80, %cst_41 [1] : vector<12x32xf32> to vector<12xf32>
    %82 = vector.shape_cast %81 : vector<12xf32> to vector<12x1xf32>
    %cst_42 = arith.constant 3.200000e+01 : f32
    %83 = vector.broadcast %cst_42 : f32 to vector<12x1xf32>
    %84 = arith.divf %82, %83 : vector<12x1xf32>
    %cst_43 = arith.constant 9.99999974E-6 : f32
    %85 = vector.broadcast %cst_43 : f32 to vector<12x1xf32>
    %86 = arith.addf %84, %85 : vector<12x1xf32>
    %87 = math.rsqrt %86 : vector<12x1xf32>
    %88 = vector.broadcast %87 : vector<12x1xf32> to vector<12x32xf32>
    %89 = arith.mulf %79, %88 : vector<12x32xf32>
    %90 = tpu.concatenate %89, %10 in 1 : vector<12x32xf32>, vector<12x8xf32> -> vector<12x40xf32>
    %c1 = arith.constant 1 : index
    %c0_44 = arith.constant 0 : index
    %c0_45 = arith.constant 0 : index
    %91 = vector.load %arg6[%c1, %c0_44, %c0_45] : memref<2x40x160xf32, #tpu.memory_space<vmem>>, vector<1x40x96xf32>
    %92 = vector.shape_cast %91 : vector<1x40x96xf32> to vector<40x96xf32>
    %cst_46 = arith.constant dense<0.000000e+00> : vector<12x96xf32>
    %93 = tpu.matmul %90, %92, %cst_46 {dimension_numbers = #tpu.dot_dimension_numbers<[1], [0], [0], [1], [0, 0, 1, 1], [], []>} : vector<12x40xf32>, vector<40x96xf32>, vector<12x96xf32> -> vector<12x96xf32>
    %94 = vector.extract_strided_slice %93 {offsets = [0, 0], sizes = [12, 32], strides = [1, 1]} : vector<12x96xf32> to vector<12x32xf32>
    %95 = vector.extract_strided_slice %93 {offsets = [0, 32], sizes = [12, 32], strides = [1, 1]} : vector<12x96xf32> to vector<12x32xf32>
    %96 = vector.extract_strided_slice %93 {offsets = [0, 64], sizes = [12, 32], strides = [1, 1]} : vector<12x96xf32> to vector<12x32xf32>
    %cst_47 = arith.constant dense<0.000000e+00> : vector<12x12xf32>
    %97 = tpu.matmul %94, %95, %cst_47 {dimension_numbers = #tpu.dot_dimension_numbers<[1], [1], [0], [0], [0, 0, 1, 0], [], []>} : vector<12x32xf32>, vector<12x32xf32>, vector<12x12xf32> -> vector<12x12xf32>
    %98 = arith.addf %97, %7 : vector<12x12xf32>
    %cst_48 = arith.constant dense<0xFF800000> : vector<12xf32>
    %99 = vector.multi_reduction <maximumf>, %98, %cst_48 [1] : vector<12x12xf32> to vector<12xf32>
    %100 = vector.shape_cast %99 : vector<12xf32> to vector<12x1xf32>
    %101 = vector.broadcast %100 : vector<12x1xf32> to vector<12x12xf32>
    %102 = arith.subf %98, %101 : vector<12x12xf32>
    %103 = math.exp %102 : vector<12x12xf32>
    %cst_49 = arith.constant dense<0.000000e+00> : vector<12xf32>
    %104 = vector.multi_reduction <add>, %103, %cst_49 [1] : vector<12x12xf32> to vector<12xf32>
    %105 = vector.shape_cast %104 : vector<12xf32> to vector<12x1xf32>
    %106 = tpu.reciprocal %105 {approx = true} : vector<12x1xf32> -> vector<12x1xf32>
    %107 = vector.broadcast %106 : vector<12x1xf32> to vector<12x12xf32>
    %108 = arith.mulf %103, %107 : vector<12x12xf32>
    %cst_50 = arith.constant dense<0.000000e+00> : vector<12x32xf32>
    %109 = tpu.matmul %108, %96, %cst_50 {dimension_numbers = #tpu.dot_dimension_numbers<[1], [0], [0], [1], [0, 0, 1, 1], [], []>} : vector<12x12xf32>, vector<12x32xf32>, vector<12x32xf32> -> vector<12x32xf32>
    %110 = arith.addf %109, %73 : vector<12x32xf32>
    %cst_51 = arith.constant dense<0.000000e+00> : vector<12xf32>
    %111 = vector.multi_reduction <add>, %110, %cst_51 [1] : vector<12x32xf32> to vector<12xf32>
    %112 = vector.shape_cast %111 : vector<12xf32> to vector<12x1xf32>
    %cst_52 = arith.constant 3.200000e+01 : f32
    %113 = vector.broadcast %cst_52 : f32 to vector<12x1xf32>
    %114 = arith.divf %112, %113 : vector<12x1xf32>
    %115 = vector.broadcast %114 : vector<12x1xf32> to vector<12x32xf32>
    %116 = arith.subf %110, %115 : vector<12x32xf32>
    %117 = arith.mulf %116, %116 : vector<12x32xf32>
    %cst_53 = arith.constant dense<0.000000e+00> : vector<12xf32>
    %118 = vector.multi_reduction <add>, %117, %cst_53 [1] : vector<12x32xf32> to vector<12xf32>
    %119 = vector.shape_cast %118 : vector<12xf32> to vector<12x1xf32>
    %cst_54 = arith.constant 3.200000e+01 : f32
    %120 = vector.broadcast %cst_54 : f32 to vector<12x1xf32>
    %121 = arith.divf %119, %120 : vector<12x1xf32>
    %cst_55 = arith.constant 9.99999974E-6 : f32
    %122 = vector.broadcast %cst_55 : f32 to vector<12x1xf32>
    %123 = arith.addf %121, %122 : vector<12x1xf32>
    %124 = math.rsqrt %123 : vector<12x1xf32>
    %125 = vector.broadcast %124 : vector<12x1xf32> to vector<12x32xf32>
    %126 = arith.mulf %116, %125 : vector<12x32xf32>
    %127 = tpu.concatenate %126, %10 in 1 : vector<12x32xf32>, vector<12x8xf32> -> vector<12x40xf32>
    %c1_56 = arith.constant 1 : index
    %c0_57 = arith.constant 0 : index
    %c96_58 = arith.constant 96 : index
    %128 = vector.load %arg6[%c1_56, %c0_57, %c96_58] : memref<2x40x160xf32, #tpu.memory_space<vmem>>, vector<1x40x32xf32>
    %129 = vector.shape_cast %128 : vector<1x40x32xf32> to vector<40x32xf32>
    %cst_59 = arith.constant dense<0.000000e+00> : vector<12x32xf32>
    %130 = tpu.matmul %127, %129, %cst_59 {dimension_numbers = #tpu.dot_dimension_numbers<[1], [0], [0], [1], [0, 0, 1, 1], [], []>} : vector<12x40xf32>, vector<40x32xf32>, vector<12x32xf32> -> vector<12x32xf32>
    %cst_60 = arith.constant 0.000000e+00 : f32
    %131 = vector.broadcast %cst_60 : f32 to vector<12x32xf32>
    %132 = arith.maximumf %130, %131 : vector<12x32xf32>
    %133 = tpu.concatenate %132, %10 in 1 : vector<12x32xf32>, vector<12x8xf32> -> vector<12x40xf32>
    %c1_61 = arith.constant 1 : index
    %c0_62 = arith.constant 0 : index
    %c128_63 = arith.constant 128 : index
    %134 = vector.load %arg6[%c1_61, %c0_62, %c128_63] : memref<2x40x160xf32, #tpu.memory_space<vmem>>, vector<1x40x32xf32>
    %135 = vector.shape_cast %134 : vector<1x40x32xf32> to vector<40x32xf32>
    %cst_64 = arith.constant dense<0.000000e+00> : vector<12x32xf32>
    %136 = tpu.matmul %133, %135, %cst_64 {dimension_numbers = #tpu.dot_dimension_numbers<[1], [0], [0], [1], [0, 0, 1, 1], [], []>} : vector<12x40xf32>, vector<40x32xf32>, vector<12x32xf32> -> vector<12x32xf32>
    %137 = vector.extract_strided_slice %3 {offsets = [0, 0], sizes = [12, 1], strides = [1, 1]} : vector<12x3xf32> to vector<12x1xf32>
    %138 = vector.extract_strided_slice %5 {offsets = [0, 0], sizes = [1, 12], strides = [1, 1]} : vector<3x12xf32> to vector<1x12xf32>
    %139 = vector.broadcast %137 : vector<12x1xf32> to vector<12x12xf32>
    %140 = vector.broadcast %138 : vector<1x12xf32> to vector<12x12xf32>
    %141 = arith.subf %139, %140 : vector<12x12xf32>
    %142 = vector.extract_strided_slice %3 {offsets = [0, 1], sizes = [12, 1], strides = [1, 1]} : vector<12x3xf32> to vector<12x1xf32>
    %143 = vector.extract_strided_slice %5 {offsets = [1, 0], sizes = [1, 12], strides = [1, 1]} : vector<3x12xf32> to vector<1x12xf32>
    %144 = vector.broadcast %142 : vector<12x1xf32> to vector<12x12xf32>
    %145 = vector.broadcast %143 : vector<1x12xf32> to vector<12x12xf32>
    %146 = arith.subf %144, %145 : vector<12x12xf32>
    %147 = vector.extract_strided_slice %3 {offsets = [0, 2], sizes = [12, 1], strides = [1, 1]} : vector<12x3xf32> to vector<12x1xf32>
    %148 = vector.extract_strided_slice %5 {offsets = [2, 0], sizes = [1, 12], strides = [1, 1]} : vector<3x12xf32> to vector<1x12xf32>
    %149 = vector.broadcast %147 : vector<12x1xf32> to vector<12x12xf32>
    %150 = vector.broadcast %148 : vector<1x12xf32> to vector<12x12xf32>
    %151 = arith.subf %149, %150 : vector<12x12xf32>
    %152 = arith.mulf %141, %141 : vector<12x12xf32>
    %153 = arith.mulf %146, %146 : vector<12x12xf32>
    %154 = arith.addf %152, %153 : vector<12x12xf32>
    %155 = arith.mulf %151, %151 : vector<12x12xf32>
    %156 = arith.addf %154, %155 : vector<12x12xf32>
    %157 = math.sqrt %156 : vector<12x12xf32>
    %cst_65 = arith.constant 0.000000e+00 : f32
    %158 = vector.broadcast %cst_65 : f32 to vector<12x12xf32>
    %159 = arith.subf %158, %157 : vector<12x12xf32>
    %160 = math.exp %159 : vector<12x12xf32>
    %161 = tpu.concatenate %136, %10 in 1 : vector<12x32xf32>, vector<12x8xf32> -> vector<12x40xf32>
    %c0_66 = arith.constant 0 : index
    %c0_67 = arith.constant 0 : index
    %162 = vector.load %arg7[%c0_66, %c0_67] : memref<41x64xf32, #tpu.memory_space<vmem>>, vector<40x64xf32>
    %cst_68 = arith.constant dense<0.000000e+00> : vector<12x64xf32>
    %163 = tpu.matmul %161, %162, %cst_68 {dimension_numbers = #tpu.dot_dimension_numbers<[1], [0], [0], [1], [0, 0, 1, 1], [], []>} : vector<12x40xf32>, vector<40x64xf32>, vector<12x64xf32> -> vector<12x64xf32>
    %164 = vector.extract_strided_slice %163 {offsets = [0, 0], sizes = [12, 32], strides = [1, 1]} : vector<12x64xf32> to vector<12x32xf32>
    %165 = vector.extract_strided_slice %163 {offsets = [0, 32], sizes = [12, 32], strides = [1, 1]} : vector<12x64xf32> to vector<12x32xf32>
    %cst_69 = arith.constant dense<0.000000e+00> : vector<12x12xf32>
    %166 = tpu.matmul %164, %165, %cst_69 {dimension_numbers = #tpu.dot_dimension_numbers<[1], [1], [0], [0], [0, 0, 1, 0], [], []>} : vector<12x32xf32>, vector<12x32xf32>, vector<12x12xf32> -> vector<12x12xf32>
    %167 = arith.addf %166, %160 : vector<12x12xf32>
    %cst_70 = arith.constant 0.000000e+00 : f32
    %168 = vector.broadcast %cst_70 : f32 to vector<12x12xf32>
    %169 = arith.cmpf oeq, %9, %168 : vector<12x12xf32>
    %cst_71 = arith.constant -1.000000e+09 : f32
    %170 = vector.broadcast %cst_71 : f32 to vector<12x12xf32>
    %171 = arith.select %169, %170, %167 : vector<12x12xi1>, vector<12x12xf32>
    %cst_72 = arith.constant dense<0xFF800000> : vector<12xf32>
    %172 = vector.multi_reduction <maximumf>, %171, %cst_72 [1] : vector<12x12xf32> to vector<12xf32>
    %173 = vector.shape_cast %172 : vector<12xf32> to vector<12x1xf32>
    %174 = vector.broadcast %173 : vector<12x1xf32> to vector<12x12xf32>
    %175 = arith.subf %171, %174 : vector<12x12xf32>
    %176 = math.exp %175 : vector<12x12xf32>
    %cst_73 = arith.constant dense<0.000000e+00> : vector<12xf32>
    %177 = vector.multi_reduction <add>, %176, %cst_73 [1] : vector<12x12xf32> to vector<12xf32>
    %178 = vector.shape_cast %177 : vector<12xf32> to vector<12x1xf32>
    %179 = tpu.reciprocal %178 {approx = true} : vector<12x1xf32> -> vector<12x1xf32>
    %180 = vector.broadcast %179 : vector<12x1xf32> to vector<12x12xf32>
    %181 = arith.mulf %176, %180 : vector<12x12xf32>
    %c40 = arith.constant 40 : index
    %c0_74 = arith.constant 0 : index
    %182 = vector.load %arg7[%c40, %c0_74] : memref<41x64xf32, #tpu.memory_space<vmem>>, vector<1x40xf32>
    %cst_75 = arith.constant dense<0.000000e+00> : vector<1x12xf32>
    %183 = tpu.matmul %182, %161, %cst_75 {dimension_numbers = #tpu.dot_dimension_numbers<[1], [1], [0], [0], [0, 0, 1, 0], [], []>} : vector<1x40xf32>, vector<12x40xf32>, vector<1x12xf32> -> vector<1x12xf32>
    %c40_76 = arith.constant 40 : index
    %c40_77 = arith.constant 40 : index
    %184 = vector.load %arg7[%c40_76, %c40_77] : memref<41x64xf32, #tpu.memory_space<vmem>>, vector<1x1xf32>
    %185 = vector.broadcast %183 : vector<1x12xf32> to vector<12x12xf32>
    %186 = arith.mulf %181, %185 : vector<12x12xf32>
    %cst_78 = arith.constant 9.99999997E-7 : f32
    %187 = vector.broadcast %cst_78 : f32 to vector<12x12xf32>
    %188 = arith.addf %157, %187 : vector<12x12xf32>
    %189 = arith.divf %186, %188 : vector<12x12xf32>
    %190 = vector.extract_strided_slice %189 {offsets = [0, 0], sizes = [12, 3], strides = [1, 1]} : vector<12x12xf32> to vector<12x3xf32>
    %191 = vector.extract_strided_slice %189 {offsets = [0, 3], sizes = [12, 3], strides = [1, 1]} : vector<12x12xf32> to vector<12x3xf32>
    %192 = arith.addf %190, %191 : vector<12x3xf32>
    %193 = vector.extract_strided_slice %189 {offsets = [0, 6], sizes = [12, 3], strides = [1, 1]} : vector<12x12xf32> to vector<12x3xf32>
    %194 = arith.addf %192, %193 : vector<12x3xf32>
    %195 = vector.extract_strided_slice %189 {offsets = [0, 9], sizes = [12, 3], strides = [1, 1]} : vector<12x12xf32> to vector<12x3xf32>
    %196 = arith.addf %194, %195 : vector<12x3xf32>
    %197 = arith.mulf %196, %3 : vector<12x3xf32>
    %cst_79 = arith.constant dense<0.000000e+00> : vector<12xf32>
    %198 = vector.multi_reduction <add>, %197, %cst_79 [1] : vector<12x3xf32> to vector<12xf32>
    %199 = vector.shape_cast %198 : vector<12xf32> to vector<12x1xf32>
    %200 = vector.extract_strided_slice %196 {offsets = [0, 0], sizes = [12, 1], strides = [1, 1]} : vector<12x3xf32> to vector<12x1xf32>
    %201 = vector.extract_strided_slice %5 {offsets = [0, 0], sizes = [1, 12], strides = [1, 1]} : vector<3x12xf32> to vector<1x12xf32>
    %202 = vector.broadcast %200 : vector<12x1xf32> to vector<12x12xf32>
    %203 = vector.broadcast %201 : vector<1x12xf32> to vector<12x12xf32>
    %204 = arith.mulf %202, %203 : vector<12x12xf32>
    %205 = vector.extract_strided_slice %196 {offsets = [0, 1], sizes = [12, 1], strides = [1, 1]} : vector<12x3xf32> to vector<12x1xf32>
    %206 = vector.extract_strided_slice %5 {offsets = [1, 0], sizes = [1, 12], strides = [1, 1]} : vector<3x12xf32> to vector<1x12xf32>
    %207 = vector.broadcast %205 : vector<12x1xf32> to vector<12x12xf32>
    %208 = vector.broadcast %206 : vector<1x12xf32> to vector<12x12xf32>
    %209 = arith.mulf %207, %208 : vector<12x12xf32>
    %210 = arith.addf %204, %209 : vector<12x12xf32>
    %211 = vector.extract_strided_slice %196 {offsets = [0, 2], sizes = [12, 1], strides = [1, 1]} : vector<12x3xf32> to vector<12x1xf32>
    %212 = vector.extract_strided_slice %5 {offsets = [2, 0], sizes = [1, 12], strides = [1, 1]} : vector<3x12xf32> to vector<1x12xf32>
    %213 = vector.broadcast %211 : vector<12x1xf32> to vector<12x12xf32>
    %214 = vector.broadcast %212 : vector<1x12xf32> to vector<12x12xf32>
    %215 = arith.mulf %213, %214 : vector<12x12xf32>
    %216 = arith.addf %210, %215 : vector<12x12xf32>
    %217 = vector.broadcast %199 : vector<12x1xf32> to vector<12x12xf32>
    %218 = arith.subf %217, %216 : vector<12x12xf32>
    %219 = vector.broadcast %184 : vector<1x1xf32> to vector<12x12xf32>
    %220 = arith.addf %218, %219 : vector<12x12xf32>
    %c0_80 = arith.constant 0 : index
    %c0_81 = arith.constant 0 : index
    %c0_82 = arith.constant 0 : index
    %221 = vector.load %arg8[%c0_80, %c0_81, %c0_82] : memref<1x12x12xf32, #tpu.memory_space<vmem>>, vector<1x12x12xf32>
    %222 = vector.shape_cast %221 : vector<1x12x12xf32> to vector<12x12xf32>
    %223 = vector.shape_cast %220 : vector<12x12xf32> to vector<1x12x12xf32>
    tpu.vector_store %arg8[%c0_80, %c0_81, %c0_82], %223 {strides = array<i32>} : memref<1x12x12xf32, #tpu.memory_space<vmem>>, vector<1x12x12xf32>,
    return
  }
  func.func @transform_0(%arg0: i32) -> (i32, i32, i32) {
    %c0_i32 = arith.constant 0 : i32
    %c0_i32_0 = arith.constant 0 : i32
    %c0_i32_1 = arith.constant 0 : i32
    return %arg0, %c0_i32, %c0_i32_0 : i32, i32, i32
  }
  func.func @transform_1(%arg0: i32) -> (i32, i32, i32) {
    %c0_i32 = arith.constant 0 : i32
    %c0_i32_0 = arith.constant 0 : i32
    %c0_i32_1 = arith.constant 0 : i32
    return %arg0, %c0_i32, %c0_i32_0 : i32, i32, i32
  }
  func.func @transform_2(%arg0: i32) -> (i32, i32, i32) {
    %c0_i32 = arith.constant 0 : i32
    %c0_i32_0 = arith.constant 0 : i32
    %c0_i32_1 = arith.constant 0 : i32
    return %arg0, %c0_i32, %c0_i32_0 : i32, i32, i32
  }
  func.func @transform_3(%arg0: i32) -> (i32, i32, i32) {
    %c0_i32 = arith.constant 0 : i32
    %c0_i32_0 = arith.constant 0 : i32
    %c0_i32_1 = arith.constant 0 : i32
    return %arg0, %c0_i32, %c0_i32_0 : i32, i32, i32
  }
  func.func @transform_4(%arg0: i32) -> (i32, i32, i32) {
    %c0_i32 = arith.constant 0 : i32
    %c0_i32_0 = arith.constant 0 : i32
    %c0_i32_1 = arith.constant 0 : i32
    return %arg0, %c0_i32, %c0_i32_0 : i32, i32, i32
  }
  func.func @transform_5(%arg0: i32) -> (i32, i32, i32) {
    %c0_i32 = arith.constant 0 : i32
    %c0_i32_0 = arith.constant 0 : i32
    %c0_i32_1 = arith.constant 0 : i32
    %c0_i32_2 = arith.constant 0 : i32
    return %c0_i32, %c0_i32_0, %c0_i32_1 : i32, i32, i32
  }
  func.func @transform_6(%arg0: i32) -> (i32, i32) {
    %c0_i32 = arith.constant 0 : i32
    %c0_i32_0 = arith.constant 0 : i32
    %c0_i32_1 = arith.constant 0 : i32
    return %c0_i32, %c0_i32_0 : i32, i32
  }
  func.func @transform_7(%arg0: i32) -> (i32, i32, i32) {
    %c0_i32 = arith.constant 0 : i32
    %c0_i32_0 = arith.constant 0 : i32
    %c0_i32_1 = arith.constant 0 : i32
    return %arg0, %c0_i32, %c0_i32_0 : i32, i32, i32
  }
}

</mosaic_0001>

<bundles_post_ra>
// kernel: tpu_custom_call.1
= control target key start
LH: loop header
LB: loop body
LE: loop exit
PB: predicated region body
PF: predicated region fallthrough
CT: control target
= control target key end

     0   :  { %12 = vsyncpa [#allocation3], 0  ;;  %s1719_s24 = smov 0   ;;  %s2016_s0 = inlined_call_operand.vmem [shape: f32[2,12,32], index: 0, kind: input, shape index: {}]   ;;  %s2017_s1 = inlined_call_operand.vmem [shape: f32[2,12,3], index: 1, kind: input, shape index: {}]   ;;  %s2018_s2 = inlined_call_operand.vmem [shape: f32[2,3,12], index: 2, kind: input, shape index: {}]   ;;  %s2019_s3 = inlined_call_operand.vmem [shape: f32[2,12,12], index: 3, kind: input, shape index: {}]   ;;  %s2020_s4 = inlined_call_operand.vmem [shape: f32[2,12,12], index: 4, kind: input, shape index: {}]   ;;  %s2021_s5 = inlined_call_operand.hbm [shape: f32[2,40,160], index: 5, kind: input, shape index: {}]   ;;  %s2022_s6 = inlined_call_operand.vmem [shape: f32[41,64], index: 6, kind: input, shape index: {}]   ;;  %s2023_s7 = inlined_call_operand.vmem [shape: f32[2,12,12], index: 7, kind: output, shape index: {}]  }
   0x1 LB: > { %s232_s27 = sshll.u32 %s2021_s5, 4  ;;  %s1443_s28 = sadd.s32 4294967295, %s1663_s24   ;;  %s1663_s24 = sphi %s1719_s24, %s18_s24   ;;  %s233_s27 = int_to_ptr.hbm [resolvable:$true] %s232_s27 }
   0x2   : > { %p1445_p0 = scmp.ge.s32.totalorder %s1663_s24, 1  ;;  %p221_p1 = scmp.lt.s32.totalorder %s1663_s24, 3 }
   0x3   : > { %p1513_p2 = scmp.eq.s32.totalorder %s1443_s28, 0  ;;  %s1665_s29 = smov [#allocation2]  }
   0x4   : > { %p222_p3 = pnand %p1445_p0, %p221_p1  ;;  %s234_s30 = sshll.u32 %s1665_s29, 4  ;;  %s235_s30 = int_to_ptr.vmem [resolvable:$true] %s234_s30 }
   0x5   : > { %s1666_s8 = smov 256   ;;  %s1667_s9 = smov 16  }
   0x6   : > { %p1509_p4 = pneg %p222_p3  ;;  %292 = sbr.rel (%p222_p3) target bundleno = 4154 (0x103a), region = 48 }
   0x8   : > { %p1510_p5 = pnand %p1513_p2, %p1509_p4 }
   0xa   : > { %1512 = dma.hbm_to_vmem [thread:$0]  (!%p1510_p5), %s233_s27, 2560, %s235_s30, [#allocation3], %s1666_s8, %s1666_s8, %s1667_s9  }
   0xb   : > { %1658 = dma.done.wait (%p1513_p2), [#allocation3], 2560  }
   0xc   : > { %1660 = vsyncadd (%p1513_p2), [#allocation3], 4294964736  ;;  %p344_p6 = scmp.lt.s32.totalorder %s1443_s28, 1  ;;  %vm382_vm0 = vcmask 261120   ;;  %vm386_vm1 = vcmask 257024   ;;  %v1668_v4 = vmov 32.0  }
   0xd   : > { %1569 = vrcp.f32 %v1668_v4  ;;  %v1755_v21 = vld [vmem:[#allocation2 + $0x40] sm:$0xff]  ;;  %v1758_v22 = vld [vmem:[#allocation2 + $0x30] sm:$0xff]  ;;  %vm442_vm6 = vcmask 326656   ;;  %s1669_s14 = smov 96   ;;  %vm509_vm10 = vcmask 97280   ;;  %vm513_vm11 = vcmask 93184  }
   0xe   : > { %s2025_s28 = smov (!%p344_p6, %s1443_s28), 1  ;;  %460 = vmatpush.msra.mxu0 %v1755_v21  ;;  %v1761_v23 = vld [vmem:[#allocation2 + $0x20] sm:$0xff]  ;;  %v1764_v24 = vld [vmem:[#allocation2 + $0x10] sm:$0xff]  ;;  %v1537_v26 = vpack.i.bf16 %v1758_v22, %v1755_v21  ;;  %s1670_s18 = smov 64   ;;  %vm544_vm12 = vcmask 1043456  }
   0xf   : > { %s1733_s10 = sshll.u32 %s2025_s28, 4  ;;  %v1767_v25 = vld [vmem:[#allocation2] sm:$0xff]  ;;  %v1542_v27 = vpack.i.bf16 %v1764_v24, %v1761_v23  ;;  %s1671_s19 = smov 32  }
  0x10   : > { %s348_s13 = scalar_lea.vmem %s2016_s0, %s1733_s10  ;;  %461 = vmatpush.msra.mxu0 %v1758_v22  ;;  %s362_s17 = scalar_lea.vmem %s2019_s3, %s1733_s10 }
  0x11   : > { %v1739_v0 = vld [vmem:[%s348_s13] sm:$0xff]  ;;  %v1743_v2 = vld [vmem:[%s348_s13 + $0x8] sm:$0xf]  ;;  %s353_s12 = scalar_lea.vmem %s2017_s1, %s1733_s10  ;;  %s1454_s13 = sshll.u32 %s2025_s28, 2 }
  0x12   : > { %v383_v1 = vsel %vm382_vm0, %v1739_v0, 0.0  ;;  %v387_v3 = vsel %vm386_vm1, %v1743_v2, 0.0  ;;  %462 = vmatpush.msra.mxu0 %v1761_v23  ;;  %v1790_v56 = vld [vmem:[%s362_s17] sm:$0xff]  ;;  %v1794_v60 = vld [vmem:[%s362_s17 + $0x8] sm:$0xf]  ;;  %s357_s16 = scalar_lea.vmem %s2018_s2, %s1454_s13  ;;  %s1675_s21 = smov 125  }
  0x13   : > { %384 = vadd.xlane.f32.xlu0 %v383_v1  ;;  %v1570_v5 = vpop.eup %1569  ;;  %s1676_s22 = smov 122   ;;  %s1677_s23 = smov 88  }
  0x14   : > { %v391_v6 = vmul.f32 32.0, %v1570_v5  ;;  %vm395_vm2 = vweird.f32 %v1570_v5  ;;  %463 = vmatpush.msra.mxu0 %v1764_v24  ;;  %s1678_s25 = smov 119   ;;  %s372_s30 = scalar_lea.vmem %s2023_s7, %s1733_s10 }
  0x16   : > { %v392_v7 = vsub.f32 1.0, %v391_v6  ;;  %464 = vmatpush.msra.mxu0 %v1767_v25 }
  0x18   : > { %v393_v8 = vmul.f32 %v1570_v5, %v392_v7 }
  0x1a   : > { %v394_v9 = vadd.f32 %v1570_v5, %v393_v8 }
  0x1b   : > { %388 = vadd.xlane.f32.xlu0 %v387_v3 }
  0x1c   : > { %v1747_v10 = vsel %vm395_vm2, %v1570_v5, %v394_v9 }
  0x86   : > { %v385_v11 = vpop.xlane.xlu0 %384 }
  0x87   : > { %v397_v12 = vmul.f32 %v1747_v10, %v385_v11 }
  0x89   : > { %v399_v13 = vsub.f32 %v1739_v0, %v397_v12 }
  0x8b   : > { %v401_v14 = vmul.f32 %v399_v13, %v399_v13 }
  0x8d   : > { %v403_v15 = vsel %vm382_vm0, %v401_v14, 0.0 }
  0x8e   : > { %404 = vadd.xlane.f32.xlu1 %v403_v15  ;;  %v389_v16 = vpop.xlane.xlu0 %388 }
  0x8f   : > { %v398_v17 = vmul.f32 %v1747_v10, %v389_v16 }
  0x91   : > { %v400_v18 = vsub.f32 %v1743_v2, %v398_v17 }
  0x93   : > { %v402_v19 = vmul.f32 %v400_v18, %v400_v18 }
  0x95   : > { %v406_v20 = vsel %vm386_vm1, %v402_v19, 0.0 }
  0x96   : > { %407 = vadd.xlane.f32.xlu1 %v406_v20 }
 0x101   : > { %v405_v28 = vpop.xlane.xlu1 %404 }
 0x102   : > { %v409_v29 = vmul.f32 %v405_v28, %v1747_v10 }
 0x104   : > { %v411_v30 = vadd.f32 1e-05, %v409_v29 }
 0x106   : > { %1571 = vrsqrt.f32 %v411_v30  ;;  %vm419_vm4 = vweird.f32 %v411_v30 }
 0x109   : > { %v408_v31 = vpop.xlane.xlu1 %407 }
 0x10a   : > { %v410_v32 = vmul.f32 %v408_v31, %v1747_v10 }
 0x10c   : > { %v1572_v33 = vpop.eup %1571  ;;  %v412_v34 = vadd.f32 1e-05, %v410_v32 }
 0x10d   : > { %v414_v35 = vmul.f32 %v1572_v33, %v411_v30  ;;  %vm420_vm3 = vweird.f32 %v1572_v33 }
 0x10e   : > { %1573 = vrsqrt.f32 %v412_v34  ;;  %vm421_vm5 = vmor %vm419_vm4, %vm420_vm3  ;;  %vm429_vm8 = vweird.f32 %v412_v34 }
 0x10f   : > { %v415_v36 = vmul.f32 %v1572_v33, %v414_v35 }
 0x111   : > { %v416_v37 = vmul.f32 0.5, %v415_v36 }
 0x113   : > { %v417_v38 = vsub.f32 1.5, %v416_v37 }
 0x114   : > { %v1574_v39 = vpop.eup %1573 }
 0x115   : > { %v424_v40 = vmul.f32 %v1574_v39, %v412_v34  ;;  %v418_v41 = vmul.f32 %v1572_v33, %v417_v38  ;;  %vm430_vm7 = vweird.f32 %v1574_v39 }
 0x116   : > { %vm431_vm9 = vmor %vm429_vm8, %vm430_vm7 }
 0x117   : > { %v425_v42 = vmul.f32 %v1574_v39, %v424_v40  ;;  %v422_v43 = vsel %vm421_vm5, %v1572_v33, %v418_v41 }
 0x118   : > { %v433_v44 = vmul.f32 %v422_v43, %v399_v13 }
 0x119   : > { %v426_v45 = vmul.f32 0.5, %v425_v42 }
 0x11a   : > { %v435_v46 = vsel %vm382_vm0, %v433_v44, 1.0  ;;  %v673_v44 = vld [vmem:[#allocation2 + $0x48] sm:$0xff] }
 0x11b   : > { %v427_v47 = vsub.f32 1.5, %v426_v45  ;;  %1461 = vmatmul.msk.f32.vlgmr.msra.gmra.mxu0 %vm442_vm6, %v435_v46  ;;  %v672_v45 = vld [vmem:[#allocation2 + $0x38] sm:$0xff] }
 0x11d   : > { %v428_v48 = vmul.f32 %v1574_v39, %v427_v47  ;;  %v671_v47 = vld [vmem:[#allocation2 + $0x28] sm:$0xff] }
 0x11f   : > { %v432_v49 = vsel %vm431_vm9, %v1574_v39, %v428_v48 }
 0x120   : > { %v434_v50 = vmul.f32 %v432_v49, %v400_v18 }
 0x122   : > { %v436_v51 = vsel %vm382_vm0, %v434_v50, 1.0 }
 0x123   : > { %1462 = vmatmul.msk.f32.gmra.mxu0 %vm442_vm6, %v436_v51 }
 0x198   : > { %v466_v52 = vpop.f32.mrf.mxu0 }
 0x1a0   : > { %v469_v53 = vpop.f32.mrf.mxu0 }
 0x1a1   : > { %476 = vrot.lane.b32.xlu2 %v469_v53, %s1669_s14 }
 0x1a9   : > { %474 = vrot.lane.b32.xlu2 %v466_v52, %s1669_s14 }
 0x1fb   : > { %v477_v54 = vpop.permute.xlu2 %476 }
 0x1fc   : > { %1463 = vmatpush.xpose.msk.msra.mxu1 %vm382_vm0, %v477_v54 }
 0x203   : > { %v475_v55 = vpop.permute.xlu2 %474 }
 0x204   : > { %1464 = vmatpush.xpose.msk.msra.mxu1 %vm382_vm0, %v475_v55 }
 0x207   : > { %1465 = vmatmul.msk.f32.vlgmr.msra.gmra.mxu1 %vm382_vm0, %v466_v52 }
 0x20f   : > { %1466 = vmatmul.msk.f32.gmra.mxu1 %vm382_vm0, %v469_v53 }
 0x284   : > { %v503_v57 = vpop.f32.mrf.mxu1 }
 0x285   : > { %v504_v58 = vadd.f32 %v503_v57, %v1790_v56 }
 0x287   : > { %v510_v59 = vsel %vm509_vm10, %v504_v58, -inf }
 0x288   : > { %511 = vmax.xlane.f32.xlu0 %v510_v59 }
 0x28c   : > { %v506_v61 = vpop.f32.mrf.mxu1 }
 0x28d   : > { %v507_v62 = vadd.f32 %v506_v61, %v1794_v60 }
 0x28f   : > { %v514_v63 = vsel %vm513_vm11, %v507_v62, -inf }
 0x290   : > { %515 = vmax.xlane.f32.xlu1 %v514_v63 }
 0x29c   : > { %535 = vrot.lane.b32.xlu0 %v469_v53, %s1670_s18 }
 0x2fb   : > { %v512_v1 = vpop.xlane.xlu0 %511 }
 0x2fc   : > { %v517_v3 = vsub.f32 %v504_v58, %v512_v1 }
 0x2fe   : > { %v519_v4 = vmul.f32 1.442695, %v517_v3 }
 0x300   : > { %1575 = vpow2.f32 %v519_v4 }
 0x303   : > { %v516_v5 = vpop.xlane.xlu1 %515 }
 0x304   : > { %v518_v6 = vsub.f32 %v507_v62, %v516_v5 }
 0x306   : > { %v1576_v7 = vpop.eup %1575  ;;  %v521_v8 = vmul.f32 1.442695, %v518_v6 }
 0x307   : > { %v523_v9 = vsel %vm509_vm10, %v1576_v7, 0.0 }
 0x308   : > { %1577 = vpow2.f32 %v521_v8  ;;  %524 = vadd.xlane.f32.xlu2 %v523_v9  ;;  %v670_v9 = vld [vmem:[#allocation2 + $0x18] sm:$0xff] }
 0x30e   : > { %v1578_v11 = vpop.eup %1577  ;;  %v536_v12 = vpop.permute.xlu0 %535 }
 0x30f   : > { %1467 = vmatpush.msk.msra.mxu2 %vm544_vm12, %v536_v12  ;;  %v526_v13 = vsel %vm513_vm11, %v1578_v11, 0.0 }
 0x310   : > { %527 = vadd.xlane.f32.xlu1 %v526_v13 }
 0x320   : > { %1538 = vrot.lane.b32.xlu2 %v1537_v26, %s1671_s19 }
 0x329   : > { %533 = vrot.lane.b32.xlu1 %v466_v52, %s1670_s18 }
 0x37b   : > { %v525_v14 = vpop.xlane.xlu2 %524 }
 0x37c   : > { %1579 = vrcp.f32 %v525_v14 }
 0x382   : > { %v1580_v16 = vpop.eup %1579 }
 0x383   : > { %v528_v15 = vpop.xlane.xlu1 %527  ;;  %v531_v18 = vmul.f32 %v1580_v16, %v1576_v7 }
 0x384   : > { %1581 = vrcp.f32 %v528_v15 }
 0x38a   : > { %v1582_v19 = vpop.eup %1581 }
 0x38b   : > { %v532_v20 = vmul.f32 %v1582_v19, %v1578_v11  ;;  %v669_v11 = vld [vmem:[#allocation2 + $0x8] sm:$0xff] }
 0x39b   : > { %v534_v17 = vpop.permute.xlu1 %533 }
 0x39c   : > { %562 = vmatpush.msra.mxu2 %v534_v17 }
 0x39d   : > { %1468 = vmatmul.msk.f32.vlgmr.msra.gmra.mxu2 %vm509_vm10, %v531_v18 }
 0x39e   : > { %691 = vmatpush.msrb.mxu2 %v673_v44 }
 0x3a0   : > { %692 = vmatpush.msrb.mxu2 %v672_v45 }
 0x3a2   : > { %693 = vmatpush.msrb.mxu2 %v671_v47 }
 0x3a4   : > { %694 = vmatpush.msrb.mxu2 %v670_v9 }
 0x3a5   : > { %1469 = vmatmul.msk.f32.gmra.mxu2 %vm509_vm10, %v532_v20 }
 0x3a6   : > { %695 = vmatpush.msrb.mxu2 %v669_v11 }
 0x420   : > { %v564_v28 = vpop.f32.mrf.mxu2 }
 0x421   : > { %v565_v29 = vadd.f32 %v564_v28, %v1739_v0  ;;  %v1539_v0 = vpop.permute.xlu2 %1538 }
 0x422   : > { %v1540_v37 = vunpack.i.l.bf16 %v1539_v0 }
 0x423   : > { %v570_v30 = vsel %vm382_vm0, %v565_v29, 0.0 }
 0x424   : > { %571 = vadd.xlane.f32.xlu0 %v570_v30  ;;  %653 = vmatpush.msra.mxu3 %v1540_v37  ;;  %v1853_v37 = vld [vmem:[#allocation2 + $0x70] sm:$0xff] }
 0x428   : > { %v567_v31 = vpop.f32.mrf.mxu2 }
 0x429   : > { %v568_v32 = vadd.f32 %v567_v31, %v1743_v2  ;;  %v1541_v2 = vunpack.i.h.bf16 %v1539_v0 }
 0x42b   : > { %v573_v33 = vsel %vm386_vm1, %v568_v32, 0.0  ;;  %654 = vmatpush.msra.mxu3 %v1541_v2  ;;  %v1856_v2 = vld [vmem:[#allocation2 + $0x60] sm:$0xff] }
 0x42c   : > { %574 = vadd.xlane.f32.xlu1 %v573_v33 }
 0x438   : > { %1543 = vrot.lane.b32.xlu0 %v1542_v27, %s1671_s19 }
 0x497   : > { %v572_v34 = vpop.xlane.xlu0 %571 }
 0x498   : > { %v576_v21 = vmul.f32 %v572_v34, %v1747_v10 }
 0x49a   : > { %v578_v22 = vsub.f32 %v565_v29, %v576_v21 }
 0x49c   : > { %v580_v26 = vmul.f32 %v578_v22, %v578_v22 }
 0x49e   : > { %v582_v35 = vsel %vm382_vm0, %v580_v26, 0.0 }
 0x49f   : > { %v575_v36 = vpop.xlane.xlu1 %574  ;;  %583 = vadd.xlane.f32.xlu2 %v582_v35  ;;  %v1847_v35 = vld [vmem:[#allocation2 + $0x90] sm:$0xff] }
 0x4a0   : > { %v577_v38 = vmul.f32 %v575_v36, %v1747_v10  ;;  %772 = vmatpush.msrb.mxu1 %v1847_v35  ;;  %v1850_v36 = vld [vmem:[#allocation2 + $0x80] sm:$0xff] }
 0x4a2   : > { %v579_v39 = vsub.f32 %v568_v32, %v577_v38  ;;  %773 = vmatpush.msrb.mxu1 %v1850_v36  ;;  %v1859_v38 = vld [vmem:[#allocation2 + $0x50] sm:$0xff] }
 0x4a4   : > { %v581_v40 = vmul.f32 %v579_v39, %v579_v39  ;;  %774 = vmatpush.msrb.mxu1 %v1853_v37 }
 0x4a6   : > { %v585_v23 = vsel %vm386_vm1, %v581_v40, 0.0  ;;  %775 = vmatpush.msrb.mxu1 %v1856_v2  ;;  %v1552_v40 = vpack.i.bf16 %v1856_v2, %v1853_v37 }
 0x4a7   : > { %586 = vadd.xlane.f32.xlu2 %v585_v23 }
 0x4a8   : > { %776 = vmatpush.msrb.mxu1 %v1859_v38 }
 0x4aa   : > { %v1544_v24 = vpop.permute.xlu0 %1543 }
 0x4ab   : > { %v1545_v27 = vunpack.i.l.bf16 %v1544_v24  ;;  %v1546_v41 = vunpack.i.h.bf16 %v1544_v24 }
 0x4ad   : > { %655 = vmatpush.msra.mxu3 %v1545_v27 }
 0x4af   : > { %656 = vmatpush.msra.mxu3 %v1546_v41 }
 0x4bf   : > { %621 = vrot.lane.b32.xlu2 %v1767_v25, %s1671_s19 }
 0x512   : > { %v584_v42 = vpop.xlane.xlu2 %583 }
 0x513   : > { %v588_v43 = vmul.f32 %v584_v42, %v1747_v10 }
 0x515   : > { %v590_v46 = vadd.f32 1e-05, %v588_v43 }
 0x517   : > { %1583 = vrsqrt.f32 %v590_v46  ;;  %vm598_vm14 = vweird.f32 %v590_v46 }
 0x51a   : > { %v587_v48 = vpop.xlane.xlu2 %586 }
 0x51b   : > { %v589_v49 = vmul.f32 %v587_v48, %v1747_v10 }
 0x51d   : > { %v1584_v25 = vpop.eup %1583  ;;  %v591_v50 = vadd.f32 1e-05, %v589_v49 }
 0x51e   : > { %v593_v51 = vmul.f32 %v1584_v25, %v590_v46  ;;  %vm599_vm13 = vweird.f32 %v1584_v25 }
 0x51f   : > { %1585 = vrsqrt.f32 %v591_v50  ;;  %vm600_vm15 = vmor %vm598_vm14, %vm599_vm13  ;;  %vm608_vm3 = vweird.f32 %v591_v50 }
 0x520   : > { %v594_v52 = vmul.f32 %v1584_v25, %v593_v51 }
 0x522   : > { %v595_v53 = vmul.f32 0.5, %v594_v52  ;;  %v622_v54 = vpop.permute.xlu2 %621 }
 0x523   : > { %657 = vmatpush.msra.mxu3 %v622_v54 }
 0x524   : > { %v596_v55 = vsub.f32 1.5, %v595_v53 }
 0x525   : > { %v1586_v57 = vpop.eup %1585 }
 0x526   : > { %v603_v58 = vmul.f32 %v1586_v57, %v591_v50  ;;  %v597_v59 = vmul.f32 %v1584_v25, %v596_v55  ;;  %vm609_vm2 = vweird.f32 %v1586_v57 }
 0x527   : > { %vm610_vm4 = vmor %vm608_vm3, %vm609_vm2 }
 0x528   : > { %v604_v61 = vmul.f32 %v1586_v57, %v603_v58  ;;  %v601_v62 = vsel %vm600_vm15, %v1584_v25, %v597_v59 }
 0x529   : > { %v612_v63 = vmul.f32 %v601_v62, %v578_v22 }
 0x52a   : > { %v605_v1 = vmul.f32 0.5, %v604_v61 }
 0x52b   : > { %v614_v3 = vsel %vm382_vm0, %v612_v63, 1.0 }
 0x52c   : > { %v606_v4 = vsub.f32 1.5, %v605_v1  ;;  %1470 = vmatmul.msk.f32.vlgmr.msra.gmra.mxu3 %vm442_vm6, %v614_v3 }
 0x52e   : > { %v607_v5 = vmul.f32 %v1586_v57, %v606_v4 }
 0x530   : > { %v611_v6 = vsel %vm610_vm4, %v1586_v57, %v607_v5 }
 0x531   : > { %v613_v7 = vmul.f32 %v611_v6, %v579_v39  ;;  %v1547_v39 = vpack.i.bf16 %v1850_v36, %v1847_v35 }
 0x533   : > { %v615_v8 = vsel %vm382_vm0, %v613_v7, 1.0 }
 0x534   : > { %1471 = vmatmul.msk.f32.gmra.mxu3 %vm442_vm6, %v615_v8 }
 0x5af   : > { %v659_v12 = vpop.f32.mrf.mxu3 }
 0x5b0   : > { %v665_v13 = vmax.f32 %v659_v12, 0.0 }
 0x5b2   : > { %v667_v14 = vsel %vm382_vm0, %v665_v13, 1.0 }
 0x5b3   : > { %1472 = vmatmul.msk.f32.vlgmr.msrb.gmra.mxu2 %vm442_vm6, %v667_v14 }
 0x5b7   : > { %v662_v15 = vpop.f32.mrf.mxu3 }
 0x5b8   : > { %v666_v16 = vmax.f32 %v662_v15, 0.0 }
 0x5ba   : > { %v668_v17 = vsel %vm382_vm0, %v666_v16, 1.0 }
 0x5bb   : > { %1473 = vmatmul.msk.f32.gmra.mxu2 %vm442_vm6, %v668_v17 }
 0x636   : > { %v1833_v18 = vpop.f32.mrf.mxu2 }
 0x637   : > { %v703_v19 = vsel %vm382_vm0, %v1833_v18, 0.0 }
 0x638   : > { %704 = vadd.xlane.f32.xlu1 %v703_v19 }
 0x63e   : > { %v1837_v20 = vpop.f32.mrf.mxu2 }
 0x63f   : > { %v706_v28 = vsel %vm386_vm1, %v1837_v20, 0.0 }
 0x640   : > { %707 = vadd.xlane.f32.xlu2 %v706_v28 }
 0x6ab   : > { %v705_v29 = vpop.xlane.xlu1 %704 }
 0x6ac   : > { %v709_v30 = vmul.f32 %v705_v29, %v1747_v10 }
 0x6ae   : > { %v711_v31 = vsub.f32 %v1833_v18, %v709_v30 }
 0x6b0   : > { %v713_v32 = vmul.f32 %v711_v31, %v711_v31 }
 0x6b2   : > { %v715_v33 = vsel %vm382_vm0, %v713_v32, 0.0 }
 0x6b3   : > { %716 = vadd.xlane.f32.xlu0 %v715_v33  ;;  %v708_v34 = vpop.xlane.xlu2 %707 }
 0x6b4   : > { %v710_v21 = vmul.f32 %v708_v34, %v1747_v10 }
 0x6b6   : > { %v712_v22 = vsub.f32 %v1837_v20, %v710_v21 }
 0x6b8   : > { %v714_v26 = vmul.f32 %v712_v22, %v712_v22 }
 0x6ba   : > { %v718_v0 = vsel %vm386_vm1, %v714_v26, 0.0 }
 0x6bb   : > { %719 = vadd.xlane.f32.xlu1 %v718_v0 }
 0x726   : > { %v717_v23 = vpop.xlane.xlu0 %716 }
 0x727   : > { %v721_v24 = vmul.f32 %v717_v23, %v1747_v10 }
 0x729   : > { %v723_v27 = vadd.f32 1e-05, %v721_v24 }
 0x72b   : > { %1587 = vrsqrt.f32 %v723_v27  ;;  %vm731_vm7 = vweird.f32 %v723_v27 }
 0x72e   : > { %v720_v41 = vpop.xlane.xlu1 %719 }
 0x72f   : > { %v722_v42 = vmul.f32 %v720_v41, %v1747_v10 }
 0x731   : > { %v1588_v43 = vpop.eup %1587  ;;  %v724_v44 = vadd.f32 1e-05, %v722_v42 }
 0x732   : > { %v726_v45 = vmul.f32 %v1588_v43, %v723_v27  ;;  %vm732_vm5 = vweird.f32 %v1588_v43 }
 0x733   : > { %1589 = vrsqrt.f32 %v724_v44  ;;  %vm733_vm8 = vmor %vm731_vm7, %vm732_vm5  ;;  %vm741_vm13 = vweird.f32 %v724_v44 }
 0x734   : > { %v727_v46 = vmul.f32 %v1588_v43, %v726_v45 }
 0x736   : > { %v728_v47 = vmul.f32 0.5, %v727_v46 }
 0x738   : > { %v729_v48 = vsub.f32 1.5, %v728_v47 }
 0x739   : > { %v1590_v49 = vpop.eup %1589 }
 0x73a   : > { %v730_v25 = vmul.f32 %v1588_v43, %v729_v48  ;;  %v736_v50 = vmul.f32 %v1590_v49, %v724_v44  ;;  %vm742_vm9 = vweird.f32 %v1590_v49 }
 0x73b   : > { %vm743_vm14 = vmor %vm741_vm13, %vm742_vm9 }
 0x73c   : > { %v737_v51 = vmul.f32 %v1590_v49, %v736_v50  ;;  %v734_v52 = vsel %vm733_vm8, %v1588_v43, %v730_v25 }
 0x73d   : > { %v745_v53 = vmul.f32 %v734_v52, %v711_v31 }
 0x73e   : > { %v738_v54 = vmul.f32 0.5, %v737_v51 }
 0x73f   : > { %v747_v55 = vsel %vm382_vm0, %v745_v53, 1.0 }
 0x740   : > { %v739_v57 = vsub.f32 1.5, %v738_v54  ;;  %1474 = vmatmul.msk.f32.vlgmr.msrb.gmra.mxu1 %vm442_vm6, %v747_v55  ;;  %v982_v54 = vld [vmem:[#allocation2 + $0x98] sm:$0xff]  ;;  %v981_v55 = vld [vmem:[#allocation2 + $0x88] sm:$0xff] }
 0x741   : > { %1000 = vmatpush.msra.mxu1 %v982_v54 }
 0x742   : > { %v740_v58 = vmul.f32 %v1590_v49, %v739_v57 }
 0x743   : > { %1001 = vmatpush.msra.mxu1 %v981_v55 }
 0x744   : > { %v744_v59 = vsel %vm743_vm14, %v1590_v49, %v740_v58  ;;  %v980_v58 = vld [vmem:[#allocation2 + $0x78] sm:$0xff] }
 0x745   : > { %v746_v61 = vmul.f32 %v744_v59, %v712_v22  ;;  %1002 = vmatpush.msra.mxu1 %v980_v58 }
 0x747   : > { %v748_v62 = vsel %vm382_vm0, %v746_v61, 1.0 }
 0x748   : > { %1475 = vmatmul.msk.f32.gmra.mxu1 %vm442_vm6, %v748_v62 }
 0x7bd   : > { %v778_v63 = vpop.f32.mrf.mxu1 }
 0x7c5   : > { %v781_v1 = vpop.f32.mrf.mxu1 }
 0x7c6   : > { %788 = vrot.lane.b32.xlu1 %v781_v1, %s1669_s14 }
 0x7ce   : > { %786 = vrot.lane.b32.xlu1 %v778_v63, %s1669_s14 }
 0x838   : > { %v789_v3 = vpop.permute.xlu1 %788 }
 0x839   : > { %1476 = vmatpush.xpose.msk.msrb.mxu0 %vm382_vm0, %v789_v3 }
 0x840   : > { %v787_v4 = vpop.permute.xlu1 %786 }
 0x841   : > { %1477 = vmatpush.xpose.msk.msrb.mxu0 %vm382_vm0, %v787_v4 }
 0x844   : > { %1478 = vmatmul.msk.f32.vlgmr.msrb.gmra.mxu0 %vm382_vm0, %v778_v63 }
 0x84c   : > { %1479 = vmatmul.msk.f32.gmra.mxu0 %vm382_vm0, %v781_v1 }
 0x8c1   : > { %v815_v5 = vpop.f32.mrf.mxu0 }
 0x8c2   : > { %v816_v6 = vadd.f32 %v815_v5, %v1790_v56 }
 0x8c4   : > { %v821_v7 = vsel %vm509_vm10, %v816_v6, -inf }
 0x8c5   : > { %822 = vmax.xlane.f32.xlu2 %v821_v7 }
 0x8c9   : > { %v818_v8 = vpop.f32.mrf.mxu0 }
 0x8ca   : > { %v819_v9 = vadd.f32 %v818_v8, %v1794_v60 }
 0x8cc   : > { %v824_v11 = vsel %vm513_vm11, %v819_v9, -inf }
 0x8cd   : > { %825 = vmax.xlane.f32.xlu0 %v824_v11 }
 0x8dd   : > { %845 = vrot.lane.b32.xlu2 %v781_v1, %s1670_s18 }
 0x938   : > { %v823_v12 = vpop.xlane.xlu2 %822 }
 0x939   : > { %v827_v13 = vsub.f32 %v816_v6, %v823_v12 }
 0x93b   : > { %v829_v14 = vmul.f32 1.442695, %v827_v13 }
 0x93d   : > { %1591 = vpow2.f32 %v829_v14 }
 0x940   : > { %v826_v15 = vpop.xlane.xlu0 %825  ;;  %v846_v16 = vpop.permute.xlu2 %845 }
 0x941   : > { %v828_v17 = vsub.f32 %v819_v9, %v826_v15  ;;  %1480 = vmatpush.msk.msrb.mxu3 %vm544_vm12, %v846_v16  ;;  %v979_v16 = vld [vmem:[#allocation2 + $0x68] sm:$0xff] }
 0x942   : > { %1003 = vmatpush.msra.mxu1 %v979_v16 }
 0x943   : > { %v1592_v56 = vpop.eup %1591  ;;  %v831_v19 = vmul.f32 1.442695, %v828_v17  ;;  %v978_v17 = vld [vmem:[#allocation2 + $0x58] sm:$0xff] }
 0x944   : > { %v833_v28 = vsel %vm509_vm10, %v1592_v56, 0.0  ;;  %1004 = vmatpush.msra.mxu1 %v978_v17 }
 0x945   : > { %1593 = vpow2.f32 %v831_v19  ;;  %834 = vadd.xlane.f32.xlu1 %v833_v28  ;;  %v1092_v19 = vld [vmem:[%s2022_s6 + $0x18] sm:$0xff]  ;;  %v1091_v28 = vld [vmem:[%s2022_s6 + $0x10] sm:$0xff] }
 0x94b   : > { %v1594_v60 = vpop.eup %1593 }
 0x94c   : > { %v836_v29 = vsel %vm513_vm11, %v1594_v60, 0.0 }
 0x94d   : > { %837 = vadd.xlane.f32.xlu0 %v836_v29 }
 0x961   : > { %843 = vrot.lane.b32.xlu0 %v778_v63, %s1670_s18  ;;  %s367_s18 = scalar_lea.vmem %s2020_s4, %s1733_s10 }
 0x9b8   : > { %v835_v30 = vpop.xlane.xlu1 %834 }
 0x9b9   : > { %1595 = vrcp.f32 %v835_v30 }
 0x9bf   : > { %v1596_v32 = vpop.eup %1595 }
 0x9c0   : > { %v838_v31 = vpop.xlane.xlu0 %837  ;;  %v841_v34 = vmul.f32 %v1596_v32, %v1592_v56  ;;  %v1093_v56 = vld [vmem:[%s2022_s6 + $0x20] sm:$0xff] }
 0x9c1   : > { %1597 = vrcp.f32 %v838_v31  ;;  %1111 = vmatpush.msra.mxu0 %v1093_v56 }
 0x9c3   : > { %1112 = vmatpush.msra.mxu0 %v1092_v19 }
 0x9c5   : > { %1113 = vmatpush.msra.mxu0 %v1091_v28 }
 0x9c7   : > { %v1598_v21 = vpop.eup %1597 }
 0x9c8   : > { %v842_v22 = vmul.f32 %v1598_v21, %v1594_v60  ;;  %v1090_v60 = vld [vmem:[%s2022_s6 + $0x8] sm:$0xff]  ;;  %v1089_v21 = vld [vmem:[%s2022_s6] sm:$0xff] }
 0x9c9   : > { %1114 = vmatpush.msra.mxu0 %v1090_v60 }
 0x9cb   : > { %1115 = vmatpush.msra.mxu0 %v1089_v21 }
 0x9d3   : > { %v844_v33 = vpop.permute.xlu0 %843 }
 0x9d4   : > { %871 = vmatpush.msrb.mxu3 %v844_v33 }
 0x9d5   : > { %1481 = vmatmul.msk.f32.vlgmr.msrb.gmra.mxu3 %vm509_vm10, %v841_v34 }
 0x9dd   : > { %1482 = vmatmul.msk.f32.gmra.mxu3 %vm509_vm10, %v842_v22 }
 0xa58   : > { %v873_v26 = vpop.f32.mrf.mxu3 }
 0xa59   : > { %v874_v0 = vadd.f32 %v873_v26, %v1833_v18 }
 0xa5b   : > { %v879_v23 = vsel %vm382_vm0, %v874_v0, 0.0 }
 0xa5c   : > { %880 = vadd.xlane.f32.xlu2 %v879_v23 }
 0xa60   : > { %v876_v24 = vpop.f32.mrf.mxu3 }
 0xa61   : > { %v877_v27 = vadd.f32 %v876_v24, %v1837_v20  ;;  %v1672_v24 = vmov 1  }
 0xa62   : > { %1559 = vset.pattern.permute.xlu1 %v1672_v24 }
 0xa63   : > { %v882_v41 = vsel %vm386_vm1, %v877_v27, 0.0 }
 0xa64   : > { %883 = vadd.xlane.f32.xlu0 %v882_v41  ;;  %v1943_v41 = vld [vmem:[%s353_s12 + $0x8] sm:$0xf] }
 0xa74   : > { %1553 = vrot.lane.b32.xlu2 %v1552_v40, %s1671_s19 }
 0xa78   : > { %930 = vrot.lane.b32.xlu0 %v1859_v38, %s1671_s19 }
 0xacf   : > { %v881_v42 = vpop.xlane.xlu2 %880 }
 0xad0   : > { %v885_v18 = vmul.f32 %v881_v42, %v1747_v10  ;;  %v1945_v42 = vld [vmem:[%s353_s12] sm:$0xff] }
 0xad2   : > { %v887_v43 = vsub.f32 %v874_v0, %v885_v18  ;;  %v1673_v18 = vmov 0  }
 0xad3   : > { %1558 = vset.pattern.permute.xlu0 %v1673_v18  ;;  %1557 = vset.pattern.permute.xlu2 %v1673_v18 }
 0xad4   : > { %v889_v44 = vmul.f32 %v887_v43, %v887_v43  ;;  %1019 = vperm.xlu0 %1558, %v1943_v41   ;;  %1014 = vperm.xlu2 %1557, %v1945_v42  }
 0xad6   : > { %v891_v45 = vsel %vm382_vm0, %v889_v44, 0.0  ;;  %v1674_v44 = vmov 2  }
 0xad7   : > { %v884_v46 = vpop.xlane.xlu0 %883  ;;  %892 = vadd.xlane.f32.xlu1 %v891_v45  ;;  %v1554_v63 = vpop.permute.xlu2 %1553 }
 0xad8   : > { %v886_v20 = vmul.f32 %v884_v46, %v1747_v10  ;;  %v1555_v4 = vunpack.i.l.bf16 %v1554_v63  ;;  %v1556_v7 = vunpack.i.h.bf16 %v1554_v63 }
 0xada   : > { %v888_v47 = vsub.f32 %v877_v27, %v886_v20 }
 0xadc   : > { %v890_v48 = vmul.f32 %v888_v47, %v888_v47  ;;  %1560 = vset.pattern.permute.xlu2 %v1672_v24 }
 0xadd   : > { %1030 = vperm.xlu2 %1560, %v1943_v41  }
 0xade   : > { %v894_v49 = vsel %vm386_vm1, %v890_v48, 0.0  ;;  %v377_v48 = vld [vmem:[%s357_s16] sm:$0x7] }
 0xadf   : > { %895 = vadd.xlane.f32.xlu1 %v894_v49  ;;  %v1967_v49 = vperm.slane %v377_v48, 1 }
 0xae5   : > { %1562 = vset.pattern.permute.xlu2 %v1674_v44 }
 0xae6   : > { %1041 = vperm.xlu2 %1562, %v1943_v41  }
 0xaea   : > { %v931_v9 = vpop.permute.xlu0 %930 }
 0xaee   : > { %1564 = vset.pattern.permute.xlu2 %v1673_v18  ;;  %v381_v18 = vld [vmem:[%s367_s18 + $0x8] sm:$0xf] }
 0xaef   : > { %vm1161_vm13 = vcmp.eq.f32.partialorder %v381_v18, 0.0 }
 0xaf8   : > { %1548 = vrot.lane.b32.xlu1 %v1547_v39, %s1671_s19 }
 0xb2e   : > { %v1015_v20 = vpop.permute.xlu2 %1014 }
 0xb46   : > { %v1020_v54 = vpop.permute.xlu0 %1019 }
 0xb4a   : > { %v893_v37 = vpop.xlane.xlu1 %892 }
 0xb4b   : > { %v897_v2 = vmul.f32 %v893_v37, %v1747_v10  ;;  %v1969_v37 = vperm.slane %v377_v48, 0 }
 0xb4d   : > { %v899_v38 = vadd.f32 1e-05, %v897_v2  ;;  %v1031_v2 = vpop.permute.xlu2 %1030 }
 0xb4e   : > { %v1035_v58 = vsub.f32 %v1031_v2, %v1967_v49 }
 0xb4f   : > { %1599 = vrsqrt.f32 %v899_v38  ;;  %vm907_vm12 = vweird.f32 %v899_v38 }
 0xb52   : > { %v896_v40 = vpop.xlane.xlu1 %895 }
 0xb53   : > { %v898_v25 = vmul.f32 %v896_v40, %v1747_v10  ;;  %v1023_v40 = vsub.f32 %v1015_v20, %v1969_v37 }
 0xb55   : > { %v900_v50 = vadd.f32 1e-05, %v898_v25  ;;  %v1600_v51 = vpop.eup %1599  ;;  %v1973_v25 = vperm.slane %v377_v48, 2  ;;  %v1988_v48 = vld [vmem:[%s2022_s6 + $0x28] sm:$0x1] }
 0xb56   : > { %v902_v52 = vmul.f32 %v1600_v51, %v899_v38  ;;  %vm908_vm1 = vweird.f32 %v1600_v51 }
 0xb57   : > { %1601 = vrsqrt.f32 %v900_v50  ;;  %vm909_vm15 = vmor %vm907_vm12, %vm908_vm1  ;;  %vm917_vm3 = vweird.f32 %v900_v50 }
 0xb58   : > { %v903_v53 = vmul.f32 %v1600_v51, %v902_v52  ;;  %v1047_v52 = vmul.f32 %v1023_v40, %v1023_v40 }
 0xb5a   : > { %v904_v35 = vmul.f32 0.5, %v903_v53 }
 0xb5c   : > { %v905_v39 = vsub.f32 1.5, %v904_v35  ;;  %v1024_v35 = vsub.f32 %v1020_v54, %v1969_v37 }
 0xb5d   : > { %v1602_v57 = vpop.eup %1601 }
 0xb5e   : > { %v912_v36 = vmul.f32 %v1602_v57, %v900_v50  ;;  %v906_v61 = vmul.f32 %v1600_v51, %v905_v39  ;;  %vm918_vm2 = vweird.f32 %v1602_v57 }
 0xb5f   : > { %vm919_vm4 = vmor %vm917_vm3, %vm918_vm2 }
 0xb60   : > { %v913_v59 = vmul.f32 %v1602_v57, %v912_v36  ;;  %v910_v6 = vsel %vm909_vm15, %v1600_v51, %v906_v61  ;;  %v1042_v36 = vpop.permute.xlu2 %1041  ;;  %v1048_v61 = vmul.f32 %v1024_v35, %v1024_v35 }
 0xb61   : > { %v921_v8 = vmul.f32 %v910_v6, %v887_v43 }
 0xb62   : > { %v914_v62 = vmul.f32 0.5, %v913_v59  ;;  %v1050_v59 = vmul.f32 %v1035_v58, %v1035_v58 }
 0xb63   : > { %v923_v12 = vsel %vm382_vm0, %v921_v8, 1.0 }
 0xb64   : > { %v915_v5 = vsub.f32 1.5, %v914_v62  ;;  %v1046_v62 = vsub.f32 %v1042_v36, %v1973_v25 }
 0xb66   : > { %v916_v11 = vmul.f32 %v1602_v57, %v915_v5  ;;  %v1054_v63 = vmul.f32 %v1046_v62, %v1046_v62 }
 0xb68   : > { %v920_v13 = vsel %vm919_vm4, %v1602_v57, %v916_v11 }
 0xb69   : > { %v922_v14 = vmul.f32 %v920_v13, %v888_v47 }
 0xb6a   : > { %v1549_v10 = vpop.permute.xlu1 %1548 }
 0xb6b   : > { %v1550_v1 = vunpack.i.l.bf16 %v1549_v10  ;;  %v1551_v3 = vunpack.i.h.bf16 %v1549_v10  ;;  %v924_v15 = vsel %vm382_vm0, %v922_v14, 1.0  ;;  %v1052_v10 = vadd.f32 %v1050_v59, %v1048_v61 }
 0xb6d   : > { %962 = vmatpush.msra.mxu2 %v1550_v1  ;;  %v1056_v1 = vadd.f32 %v1054_v63, %v1052_v10 }
 0xb6f   : > { %963 = vmatpush.msra.mxu2 %v1551_v3  ;;  %vm1076_vm7 = vcmp.eq.f32.partialorder %v1056_v1, inf  ;;  %vm1078_vm8 = vcmp.eq.f32.partialorder %v1056_v1, 0.0 }
 0xb71   : > { %964 = vmatpush.msra.mxu2 %v1555_v4 }
 0xb73   : > { %965 = vmatpush.msra.mxu2 %v1556_v7 }
 0xb75   : > { %966 = vmatpush.msra.mxu2 %v931_v9 }
 0xb76   : > { %1483 = vmatmul.msk.f32.vlgmr.msra.gmra.mxu2 %vm442_vm6, %v923_v12 }
 0xb7e   : > { %1484 = vmatmul.msk.f32.gmra.mxu2 %vm442_vm6, %v924_v15 }
 0xbf9   : > { %v968_v29 = vpop.f32.mrf.mxu2 }
 0xbfa   : > { %v974_v30 = vmax.f32 %v968_v29, 0.0  ;;  %v1079_v29 = vand.u32 2147483648, %v1056_v1 }
 0xbfc   : > { %v976_v31 = vsel %vm382_vm0, %v974_v30, 1.0 }
 0xbfd   : > { %1485 = vmatmul.msk.f32.vlgmr.msra.gmra.mxu1 %vm442_vm6, %v976_v31 }
 0xc01   : > { %v971_v32 = vpop.f32.mrf.mxu2 }
 0xc02   : > { %v975_v33 = vmax.f32 %v971_v32, 0.0 }
 0xc04   : > { %v977_v34 = vsel %vm382_vm0, %v975_v33, 1.0 }
 0xc05   : > { %1486 = vmatmul.msk.f32.gmra.mxu1 %vm442_vm6, %v977_v34  ;;  %v380_v34 = vld [vmem:[%s367_s18] sm:$0xff] }
 0xc06   : > { %vm1160_vm9 = vcmp.eq.f32.partialorder %v380_v34, 0.0 }
 0xc7a   : > { %v1006_v22 = vpop.f32.mrf.mxu1 }
 0xc7b   : > { %v1087_v26 = vsel %vm382_vm0, %v1006_v22, 1.0 }
 0xc7c   : > { %1487 = vmatmul.msk.f32.vlgmr.msra.gmra.mxu0 %vm442_vm6, %v1087_v26 }
 0xc82   : > { %v1009_v0 = vpop.f32.mrf.mxu1 }
 0xc83   : > { %v1088_v23 = vsel %vm382_vm0, %v1009_v0, 1.0 }
 0xc84   : > { %1488 = vmatmul.msk.f32.gmra.mxu0 %vm442_vm6, %v1088_v23  ;;  %1493 = vmatpush.xpose.msk.msrb.mxu2 %vm442_vm6, %v1088_v23 }
 0xc88   : > { %1494 = vmatpush.xpose.msk.msrb.mxu2 %vm442_vm6, %v1087_v26 }
 0xc8b   : > { %1495 = vmatmul.msk.f32.vlgmr.msrb.gmra.mxu2 %vm442_vm6, %v1988_v48 }
 0xcf9   : > { %v1117_v27 = vpop.f32.mrf.mxu0 }
 0xd01   : > { %v1120_v43 = vpop.f32.mrf.mxu0 }
 0xd02   : > { %1127 = vrot.lane.b32.xlu1 %v1120_v43, %s1669_s14 }
 0xd0a   : > { %1125 = vrot.lane.b32.xlu1 %v1117_v27, %s1669_s14 }
 0xd12   : > { %1026 = vperm.xlu1 %1559, %v1945_v42  }
 0xd1a   : > { %1561 = vset.pattern.permute.xlu1 %v1674_v44 }
 0xd1b   : > { %1037 = vperm.xlu1 %1561, %v1945_v42  }
 0xd23   : > { %1563 = vset.pattern.permute.xlu1 %v1672_v24 }
 0xd74   : > { %v1128_v45 = vpop.permute.xlu1 %1127 }
 0xd75   : > { %1489 = vmatpush.xpose.msk.msra.mxu3 %vm382_vm0, %v1128_v45 }
 0xd7c   : > { %v1126_v46 = vpop.permute.xlu1 %1125 }
 0xd7d   : > { %1490 = vmatpush.xpose.msk.msra.mxu3 %vm382_vm0, %v1126_v46 }
 0xd80   : > { %1491 = vmatmul.msk.f32.vlgmr.msra.gmra.mxu3 %vm382_vm0, %v1117_v27 }
 0xd84   : > { %v1027_v47 = vpop.permute.xlu1 %1026 }
 0xd85   : > { %v1034_v38 = vsub.f32 %v1027_v47, %v1967_v49 }
 0xd87   : > { %v1049_v51 = vmul.f32 %v1034_v38, %v1034_v38 }
 0xd88   : > { %1492 = vmatmul.msk.f32.gmra.mxu3 %vm382_vm0, %v1120_v43 }
 0xd89   : > { %v1051_v55 = vadd.f32 %v1049_v51, %v1047_v52 }
 0xd8d   : > { %v1038_v50 = vpop.permute.xlu1 %1037 }
 0xd8e   : > { %v1045_v53 = vsub.f32 %v1038_v50, %v1973_v25 }
 0xd90   : > { %v1053_v57 = vmul.f32 %v1045_v53, %v1045_v53 }
 0xd92   : > { %v1055_v39 = vadd.f32 %v1053_v57, %v1051_v55 }
 0xd94   : > { %1603 = vrsqrt.f32 %v1055_v39  ;;  %vm1064_vm0 = vcmp.eq.f32.partialorder %v1055_v39, inf  ;;  %v1067_v16 = vand.u32 2147483648, %v1055_v39  ;;  %vm1066_vm5 = vcmp.eq.f32.partialorder %v1055_v39, 0.0 }
 0xd95   : > { %1605 = vrsqrt.f32 %v1056_v1 }
 0xd9a   : > { %v1604_v3 = vpop.eup %1603 }
 0xd9b   : > { %v1058_v4 = vmul.f32 %v1604_v3, %v1055_v39  ;;  %v1606_v6 = vpop.eup %1605 }
 0xd9c   : > { %v1070_v8 = vmul.f32 %v1606_v6, %v1056_v1 }
 0xd9d   : > { %v1059_v5 = vmul.f32 %v1604_v3, %v1058_v4 }
 0xd9e   : > { %v1071_v11 = vmul.f32 %v1606_v6, %v1070_v8 }
 0xd9f   : > { %v1060_v7 = vmul.f32 0.5, %v1059_v5 }
 0xda0   : > { %v1072_v13 = vmul.f32 0.5, %v1071_v11 }
 0xda1   : > { %v1061_v9 = vsub.f32 1.5, %v1060_v7 }
 0xda2   : > { %v1073_v15 = vsub.f32 1.5, %v1072_v13 }
 0xda3   : > { %v1062_v12 = vmul.f32 %v1604_v3, %v1061_v9 }
 0xda4   : > { %v1074_v56 = vmul.f32 %v1606_v6, %v1073_v15 }
 0xda5   : > { %v1063_v14 = vmul.f32 %v1062_v12, %v1055_v39 }
 0xda6   : > { %v1075_v60 = vmul.f32 %v1074_v56, %v1056_v1 }
 0xda7   : > { %v1065_v17 = vsel %vm1064_vm0, %v1055_v39, %v1063_v14  ;;  %vm1277_vm0 = vcmask 19456  }
 0xda8   : > { %v1068_v19 = vsel %vm1066_vm5, %v1067_v16, %v1065_v17  ;;  %v1077_v31 = vsel %vm1076_vm7, %v1056_v1, %v1075_v60  ;;  %v1207_v1 = vpop.f32.mrf.mxu2  ;;  %vm1273_vm5 = vcmask 23552  }
 0xda9   : > { %v1081_v28 = vsub.f32 0.0, %v1068_v19  ;;  %v1080_v32 = vsel %vm1078_vm8, %v1079_v29, %v1077_v31  ;;  %v1213_v58 = vadd.f32 1e-06, %v1068_v19  ;;  %v1210_v7 = vperm.slane %v1207_v1, 0 }
 0xdaa   : > { %v1082_v33 = vsub.f32 0.0, %v1080_v32  ;;  %v1214_v35 = vadd.f32 1e-06, %v1080_v32 }
 0xdab   : > { %v1083_v30 = vmul.f32 1.442695, %v1081_v28  ;;  %vm1220_vm6 = vweird.f32 %v1213_v58  ;;  %v1226_v3 = vand.u32 2147483648, %v1213_v58  ;;  %v1224_v5 = vand.u32 2147483647, %v1213_v58 }
 0xdac   : > { %v1085_v21 = vmul.f32 1.442695, %v1082_v33  ;;  %vm1235_vm15 = vweird.f32 %v1214_v35  ;;  %v1241_v17 = vand.u32 2147483648, %v1214_v35  ;;  %v1239_v28 = vand.u32 2147483647, %v1214_v35 }
 0xdad   : > { %1607 = vpow2.f32 %v1083_v30  ;;  %v1227_v9 = vor.u32 1.1754944e-38, %v1226_v3  ;;  %vm1225_vm12 = vcmp.eq.f32.partialorder %v1224_v5, 8.507059e+37 }
 0xdae   : > { %1609 = vpow2.f32 %v1085_v21  ;;  %v1242_v29 = vor.u32 1.1754944e-38, %v1241_v17  ;;  %vm1240_vm4 = vcmp.eq.f32.partialorder %v1239_v28, 8.507059e+37 }
 0xdb3   : > { %v1608_v22 = vpop.eup %1607 }
 0xdb4   : > { %v1610_v43 = vpop.eup %1609 }
 0xe03   : > { %v1154_v26 = vpop.f32.mrf.mxu3 }
 0xe04   : > { %v1155_v0 = vadd.f32 %v1608_v22, %v1154_v26 }
 0xe06   : > { %v1162_v23 = vsel %vm1160_vm9, -1e+09, %v1155_v0 }
 0xe07   : > { %v1164_v27 = vsel %vm509_vm10, %v1162_v23, -inf }
 0xe08   : > { %1165 = vmax.xlane.f32.xlu0 %v1164_v27 }
 0xe0b   : > { %v1157_v45 = vpop.f32.mrf.mxu3 }
 0xe0c   : > { %v1158_v46 = vadd.f32 %v1610_v43, %v1157_v45 }
 0xe0e   : > { %v1163_v20 = vsel %vm1161_vm13, -1e+09, %v1158_v46 }
 0xe0f   : > { %v1167_v47 = vsel %vm513_vm11, %v1163_v20, -inf }
 0xe10   : > { %1168 = vmax.xlane.f32.xlu1 %v1167_v47 }
 0xe7b   : > { %v1166_v2 = vpop.xlane.xlu0 %1165 }
 0xe7c   : > { %v1170_v38 = vsub.f32 %v1162_v23, %v1166_v2 }
 0xe7e   : > { %v1172_v40 = vmul.f32 1.442695, %v1170_v38 }
 0xe80   : > { %1611 = vpow2.f32 %v1172_v40 }
 0xe83   : > { %v1169_v50 = vpop.xlane.xlu1 %1168 }
 0xe84   : > { %v1171_v51 = vsub.f32 %v1163_v20, %v1169_v50 }
 0xe86   : > { %v1612_v52 = vpop.eup %1611  ;;  %v1174_v53 = vmul.f32 1.442695, %v1171_v51 }
 0xe87   : > { %v1176_v54 = vsel %vm509_vm10, %v1612_v52, 0.0 }
 0xe88   : > { %1613 = vpow2.f32 %v1174_v53  ;;  %1177 = vadd.xlane.f32.xlu2 %v1176_v54 }
 0xe89   : > { %1615 = vrcp.f32 %v1213_v58 }
 0xe8a   : > { %1617 = vrcp.f32 %v1214_v35 }
 0xe8e   : > { %v1614_v55 = vpop.eup %1613 }
 0xe8f   : > { %v1179_v57 = vsel %vm513_vm11, %v1614_v55, 0.0  ;;  %v1616_v36 = vpop.eup %1615 }
 0xe90   : > { %1180 = vadd.xlane.f32.xlu0 %v1179_v57  ;;  %v1216_v39 = vmul.f32 %v1616_v36, %v1213_v58  ;;  %v1618_v61 = vpop.eup %1617  ;;  %vm1221_vm14 = vweird.f32 %v1616_v36 }
 0xe91   : > { %v1231_v63 = vmul.f32 %v1618_v61, %v1214_v35  ;;  %vm1222_vm1 = vmor %vm1220_vm6, %vm1221_vm14  ;;  %vm1236_vm2 = vweird.f32 %v1618_v61 }
 0xe92   : > { %v1217_v59 = vsub.f32 1.0, %v1216_v39  ;;  %vm1237_vm3 = vmor %vm1235_vm15, %vm1236_vm2 }
 0xe93   : > { %v1232_v6 = vsub.f32 1.0, %v1231_v63 }
 0xe94   : > { %v1218_v10 = vmul.f32 %v1616_v36, %v1217_v59 }
 0xe95   : > { %v1233_v14 = vmul.f32 %v1618_v61, %v1232_v6 }
 0xe96   : > { %v1219_v4 = vadd.f32 %v1616_v36, %v1218_v10 }
 0xe97   : > { %v1234_v19 = vadd.f32 %v1618_v61, %v1233_v14 }
 0xe98   : > { %v1223_v12 = vsel %vm1222_vm1, %v1616_v36, %v1219_v4 }
 0xe99   : > { %v1228_v16 = vsel %vm1225_vm12, %v1227_v9, %v1223_v12  ;;  %v1238_v31 = vsel %vm1237_vm3, %v1618_v61, %v1234_v19 }
 0xe9a   : > { %v1243_v33 = vsel %vm1240_vm4, %v1242_v29, %v1238_v31 }
 0xefb   : > { %v1178_v62 = vpop.xlane.xlu2 %1177 }
 0xefc   : > { %1619 = vrcp.f32 %v1178_v62 }
 0xf02   : > { %v1620_v8 = vpop.eup %1619 }
 0xf03   : > { %v1184_v11 = vmul.f32 %v1620_v8, %v1612_v52  ;;  %v1181_v13 = vpop.xlane.xlu0 %1180 }
 0xf04   : > { %1621 = vrcp.f32 %v1181_v13 }
 0xf05   : > { %v1211_v15 = vmul.f32 %v1210_v7, %v1184_v11 }
 0xf07   : > { %v1229_v56 = vmul.f32 %v1228_v16, %v1211_v15 }
 0xf09   : > { %1247 = vrot.lane.b32.xlu1 %v1229_v56, %s1675_s21  ;;  %1255 = vrot.lane.b32.xlu0 %v1229_v56, %s1676_s22 }
 0xf0a   : > { %v1622_v60 = vpop.eup %1621 }
 0xf0b   : > { %v1185_v30 = vmul.f32 %v1622_v60, %v1614_v55 }
 0xf0d   : > { %v1212_v32 = vmul.f32 %v1210_v7, %v1185_v30 }
 0xf0f   : > { %v1244_v34 = vmul.f32 %v1243_v33, %v1212_v32 }
 0xf11   : > { %1257 = vrot.lane.b32.xlu1 %v1244_v34, %s1676_s22  ;;  %1249 = vrot.lane.b32.xlu2 %v1244_v34, %s1675_s21 }
 0xf12   : > { %1319 = vrot.lane.b32.xlu0 %v1988_v48, %s1677_s23 }
 0xf19   : > { %1265 = vrot.lane.b32.xlu1 %v1244_v34, %s1678_s25  ;;  %1263 = vrot.lane.b32.xlu2 %v1229_v56, %s1678_s25 }
 0xf6b   : > { %v1250_v21 = vpop.permute.xlu2 %1249 }
 0xf6c   : > { %v1254_v45 = vadd.f32 %v1250_v21, %v1244_v34 }
 0xf73   : > { %v1264_v27 = vpop.permute.xlu2 %1263 }
 0xf7b   : > { %v1248_v22 = vpop.permute.xlu1 %1247  ;;  %v1256_v0 = vpop.permute.xlu0 %1255 }
 0xf7c   : > { %v1253_v26 = vadd.f32 %v1248_v22, %v1229_v56 }
 0xf7e   : > { %v1261_v23 = vadd.f32 %v1256_v0, %v1253_v26 }
 0xf80   : > { %v1269_v18 = vadd.f32 %v1264_v27, %v1261_v23 }
 0xf82   : > { %1294 = vperm.xlu1 %1563, %v1269_v18   ;;  %1283 = vperm.xlu0 %1558, %v1269_v18   ;;  %v1271_v38 = vmul.f32 %v1269_v18, %v1945_v42 }
 0xf83   : > { %v1258_v43 = vpop.permute.xlu1 %1257 }
 0xf84   : > { %v1262_v46 = vadd.f32 %v1258_v43, %v1254_v45  ;;  %v1274_v40 = vsel %vm1273_vm5, %v1271_v38, 0.0 }
 0xf8a   : > { %1567 = vset.pattern.permute.xlu1 %v1674_v44  ;;  %1565 = vset.pattern.permute.xlu0 %v1672_v24  ;;  %v1320_v24 = vpop.permute.xlu0 %1319 }
 0xf8b   : > { %v1266_v20 = vpop.permute.xlu1 %1265  ;;  %1503 = vpush %v1320_v24 }
 0xf8c   : > { %v1270_v47 = vadd.f32 %v1266_v20, %v1262_v46 }
 0xf8e   : > { %1310 = vperm.xlu1 %1567, %v1270_v47   ;;  %1298 = vperm.xlu0 %1565, %v1270_v47   ;;  %v1272_v48 = vmul.f32 %v1270_v47, %v1943_v41 }
 0xf8f   : > { %1288 = vperm.xlu2 %1564, %v1270_v47  }
 0xf90   : > { %v1278_v2 = vsel %vm1277_vm0, %v1272_v48, 0.0 }
 0xf96   : > { %1568 = vset.pattern.permute.xlu0 %v1674_v44 }
 0xf97   : > { %1566 = vset.pattern.permute.xlu2 %v1674_v44 }
 0xf98   : > { %1306 = vperm.xlu2 %1566, %v1269_v18  }
 0xfb8   : > { %1279 = vadd.xlane.f32.xlu1 %v1278_v2 }
 0xfbc   : > { %s1504_s26 = spop %1503 }
 0xfbd   : > { %v1322_v39 = vstv %s1504_s26 }
 0xfc1   : > { %1275 = vadd.xlane.f32.xlu2 %v1274_v40 }
 0xfe9   : > { %v1289_v53 = vpop.permute.xlu2 %1288 }
 0xfea   : > { %v1292_v41 = vmul.f32 %v1289_v53, %v1969_v37 }
 0xff2   : > { %v1307_v59 = vpop.permute.xlu2 %1306 }
 0xff3   : > { %v1313_v63 = vmul.f32 %v1307_v59, %v1973_v25 }
 0xff4   : > { %v1284_v50 = vpop.permute.xlu0 %1283  ;;  %v1295_v51 = vpop.permute.xlu1 %1294 }
 0xff5   : > { %v1291_v58 = vmul.f32 %v1284_v50, %v1969_v37  ;;  %v1301_v35 = vmul.f32 %v1295_v51, %v1967_v49 }
 0xff7   : > { %v1303_v10 = vadd.f32 %v1301_v35, %v1291_v58 }
 0xff9   : > { %v1315_v1 = vadd.f32 %v1313_v63, %v1303_v10 }
0x1000   : > { %v1299_v52 = vpop.permute.xlu0 %1298  ;;  %v1311_v54 = vpop.permute.xlu1 %1310 }
0x1001   : > { %v1302_v44 = vmul.f32 %v1299_v52, %v1967_v49  ;;  %v1314_v57 = vmul.f32 %v1311_v54, %v1973_v25 }
0x1003   : > { %v1304_v55 = vadd.f32 %v1302_v44, %v1292_v41 }
0x1005   : > { %v1316_v42 = vadd.f32 %v1314_v57, %v1304_v55 }
0x102b   : > { %v1280_v36 = vpop.xlane.xlu1 %1279 }
0x102c   : > { %v1318_v61 = vsub.f32 %v1280_v36, %v1316_v42 }
0x102e   : > { %v1325_v62 = vadd.f32 %v1322_v39, %v1318_v61 }
0x1030   : > { %1327 = vst.msk [vmem:[%s372_s30 + $0x8] sm:$0xf] %vm513_vm11, %v1325_v62 }
0x1034   : > { %v1276_v3 = vpop.xlane.xlu2 %1275 }
0x1035   : > { %v1317_v4 = vsub.f32 %v1276_v3, %v1315_v1 }
0x1037   : > { %v1324_v37 = vadd.f32 %v1322_v39, %v1317_v4 }
0x1039   : > { %1326 = vst.msk [vmem:[%s372_s30] sm:$0xff] %vm509_vm10, %v1324_v37 }
0x103a PF: > { %s18_s24 = sadd.s32 1, %s1663_s24  }
0x103b   : > { %p15_p7 = scmp.ge.s32.totalorder %s18_s24, 4  }
0x103d   :  { %17 = sbr.rel (!%p15_p7) target bundleno = 1 (0x1), region = 96 }
0x1042   :  { %1349 = vsyncpa [#allocation3], 1 }
0x1043   :  { %1351 = vsyncpa [#allocation3 + $0x1], 1 }

</bundles_post_ra>
